<compile_context>
chip_gen: v6e
topology: v6e:2x2x1
jax: 0.10.0
libtpu: 0.0.40
codegen_flags: <defaults>
</compile_context>

<pallas_src>
import functools
import math
from typing import NamedTuple, Optional

import jax
import jax.numpy as jnp
from jax.experimental import pallas as pl
from jax.experimental.pallas import tpu as pltpu


def _round_up(x, m):
    return ((x + m - 1) // m) * m


# ----------------------------------------------------------------------------
# Pallas kernel: trunk + Pi_head + distribution-parameter heads, one batch tile.
# ----------------------------------------------------------------------------
def _actor_kernel(obs_ref, wt_ref, bt_ref, g_ref, beta_ref,
                  w1_ref, b1_ref, w2_ref, b2_ref, w3_ref, b3_ref,
                  out_ref, *, action_dim, ln_eps, fixed_stddev):
    # ---- trunk: Linear -> LayerNorm -> Tanh (obs already in matmul dtype) ---
    x = obs_ref[...]                                            # (TB, repr_dim)
    h = jnp.dot(x, wt_ref[...],
                preferred_element_type=jnp.float32) + bt_ref[...]   # (TB, F) f32
    mu = jnp.mean(h, axis=-1, keepdims=True)
    c = h - mu
    var = jnp.mean(c * c, axis=-1, keepdims=True)
    h = jnp.tanh(c * jax.lax.rsqrt(var + ln_eps) * g_ref[...] + beta_ref[...])

    # ---- Pi_head MLP (depth=2): Lin+ReLU, Lin+ReLU, Lin (padded widths) -----
    wd = w1_ref.dtype
    z = jnp.maximum(
        jnp.dot(h.astype(wd), w1_ref[...],
                preferred_element_type=jnp.float32) + b1_ref[...], 0.0)
    z = jnp.maximum(
        jnp.dot(z.astype(wd), w2_ref[...],
                preferred_element_type=jnp.float32) + b2_ref[...], 0.0)
    out = jnp.dot(z.astype(wd), w3_ref[...],
                  preferred_element_type=jnp.float32) + b3_ref[...]  # (TB, OUT_PAD)

    # ---- lane-dense fused output --------------------------------------------
    if fixed_stddev is None:
        # lanes [0:A] -> tanh(mean_tanh); lanes [A:2A] -> exp(log_std);
        # padded lanes (zero logits) -> exp(0)=1, sliced off in the wrapper.
        lane = jax.lax.broadcasted_iota(jnp.int32, out.shape, 1)
        out_ref[...] = jnp.where(lane < action_dim, jnp.tanh(out), jnp.exp(out))
    else:
        # scheduled-stddev path: head emits only mean_tanh; stddev is a constant
        # built host-side (no per-element work needed in the kernel).
        out_ref[...] = jnp.tanh(out)


# ----------------------------------------------------------------------------
# Parameters / result container / wrapper.
# ----------------------------------------------------------------------------
class TruncatedNormalParams(NamedTuple):
    """Stand-in for the returned `Pi` distribution (its parameters)."""
    mean: jax.Array
    stddev: jax.Array
    low: float
    high: float
    stddev_clip: Optional[float]


def init_actor_params(key, repr_shape, feature_dim, hidden_dim, action_dim,
                      stddev_schedule=None):
    """Deterministic init. Weights stored (in, out); biases / LN params (1, N)."""
    # TODO(synk): Utils.weight_init uses orthogonal init; plain scaled-normal here.
    repr_dim = math.prod(repr_shape)
    out_dim = action_dim * 2 if stddev_schedule is None else action_dim
    ks = jax.random.split(key, 4)

    def linear(k, fan_in, fan_out):
        w = (jax.random.normal(k, (fan_in, fan_out), jnp.float32)
             / jnp.sqrt(jnp.float32(fan_in)))
        b = jnp.zeros((1, fan_out), jnp.float32)
        return w, b

    wt, bt = linear(ks[0], repr_dim, feature_dim)     # trunk Linear
    w1, b1 = linear(ks[1], feature_dim, hidden_dim)   # Pi_head layer 1
    w2, b2 = linear(ks[2], hidden_dim, hidden_dim)    # Pi_head layer 2
    w3, b3 = linear(ks[3], hidden_dim, out_dim)       # Pi_head output
    return dict(wt=wt, bt=bt,
                ln_g=jnp.ones((1, feature_dim), jnp.float32),
                ln_b=jnp.zeros((1, feature_dim), jnp.float32),
                w1=w1, b1=b1, w2=w2, b2=b2, w3=w3, b3=b3)


def truncated_gaussian_actor_forward(params, obs, *, action_dim,
                                     stddev_schedule=None, step=None,
                                     stddev_clip=None,
                                     batch_tile=512,
                                     param_dtype=jnp.bfloat16,
                                     ln_eps=1e-5,
                                     vmem_target_bytes=48 << 20):
    obs = jnp.asarray(obs)
    B = obs.shape[0]
    obs2d = obs.reshape(B, -1).astype(param_dtype)   # flatten + cast host-side:
    repr_dim = obs2d.shape[1]                        # halves the obs HBM stream (bf16)
    feature_dim = params["wt"].shape[1]
    hidden_dim = params["w1"].shape[1]
    out_dim = params["w3"].shape[1]
    assert params["wt"].shape[0] == repr_dim

    # Scheduled stddev (constant schedules only; evaluated on host).
    if stddev_schedule is None or step is None:
        fixed_stddev = None
        assert out_dim == 2 * action_dim
    else:
        # TODO(synk): string schedules like 'linear(a,b,n)' (Utils.schedule) not parsed.
        fixed_stddev = float(stddev_schedule)
        assert out_dim == action_dim

    # ---- host-side weight prep: pad MXU-facing widths to 128, cast matmuls ---
    hid_p = _round_up(hidden_dim, 128)
    out_p = _round_up(out_dim, 128)

    def pad2(a, rows, cols):
        return jnp.pad(a, ((0, rows - a.shape[0]), (0, cols - a.shape[1])))

    weights = (
        params["wt"].astype(param_dtype),                         # (repr, F)
        params["bt"], params["ln_g"], params["ln_b"],             # (1, F) f32
        pad2(params["w1"], feature_dim, hid_p).astype(param_dtype),
        pad2(params["b1"], 1, hid_p),
        pad2(params["w2"], hid_p, hid_p).astype(param_dtype),
        pad2(params["b2"], 1, hid_p),
        pad2(params["w3"], hid_p, out_p).astype(param_dtype),
        pad2(params["b3"], 1, out_p),
    )
    # NOTE: feature_dim intentionally NOT padded (LayerNorm reduces over it).

    # ---- batch tiling: sublane-aligned, >=2 grid steps when possible, VMEM-budgeted
    sub = 16 if jnp.dtype(param_dtype).itemsize < 4 else 8
    tb = min(batch_tile, B)
    if tb < B:
        tb = max(sub, (tb // sub) * sub)
    if pl.cdiv(B, tb) < 2 and B >= 2 * sub:
        tb = _round_up((B + 1) // 2, sub)            # v7x: give both TensorCores work

    obs_item = jnp.dtype(param_dtype).itemsize
    w_bytes = sum(int(w.nbytes) for w in weights)

    def vmem_req(t):
        # conservative: obs + output double-buffered, weights counted at 2 buffers
        return 2 * t * repr_dim * obs_item + 2 * w_bytes + 2 * t * out_p * 4

    while vmem_req(tb) > vmem_target_bytes and tb > sub:
        tb = max(sub, (tb // 2 // sub) * sub)

    Bp = pl.cdiv(B, tb) * tb
    if Bp != B:
        obs2d = jnp.pad(obs2d, ((0, Bp - B), (0, 0)))
    grid = (Bp // tb,)

    vmem_limit = max(32 << 20, min(int(vmem_req(tb) * 1.25) + (4 << 20), 96 << 20))

    # ---- advisory cost estimate for XLA scheduling ---------------------------
    try:
        cost = pl.CostEstimate(
            flops=2 * Bp * (repr_dim * feature_dim + feature_dim * hid_p
                            + hid_p * hid_p + hid_p * out_p),
            transcendentals=Bp * (feature_dim + 2 * out_p),
            bytes_accessed=Bp * repr_dim * obs_item + w_bytes + Bp * out_p * 4)
    except Exception:
        cost = None

    kernel = functools.partial(_actor_kernel, action_dim=action_dim,
                               ln_eps=float(ln_eps), fixed_stddev=fixed_stddev)
    out_shape = jax.ShapeDtypeStruct((Bp, out_p), jnp.float32)
    obs_spec = pl.BlockSpec((tb, repr_dim), lambda i: (i, 0))
    out_spec = pl.BlockSpec((tb, out_p), lambda i: (i, 0))

    def run(single_buffer_weights):
        def const_spec(arr):
            idx = lambda i, _n=arr.ndim: (0,) * _n
            if single_buffer_weights:
                # Weights never change across grid steps -> one VMEM buffer, no re-DMA.
                return pl.BlockSpec(arr.shape, idx, pipeline_mode=pl.Buffered(1))
            return pl.BlockSpec(arr.shape, idx)

        call = pl.pallas_call(
            kernel,
            out_shape=out_shape,
            grid=grid,
            in_specs=[obs_spec] + [const_spec(w) for w in weights],
            out_specs=out_spec,
            compiler_params=pltpu.CompilerParams(
                dimension_semantics=("parallel",),     # batch tiles pipeline / shard TCs
                vmem_limit_bytes=vmem_limit),
            cost_estimate=cost,
        )
        return jax.block_until_ready(call(obs2d, *weights))

    try:
        y = run(single_buffer_weights=True)
    except Exception:
        # pl.Buffered(1) unsupported on this jax build -> default double buffering.
        y = run(single_buffer_weights=False)

    mean = y[:B, :action_dim]
    if fixed_stddev is None:
        stddev = y[:B, action_dim:2 * action_dim]
    else:
        stddev = jnp.full_like(mean, jnp.float32(fixed_stddev))

    # TODO(synk): TruncatedNormal sampling / log_prob and optimizer / target-net
    # bookkeeping live outside the kernel; we return the distribution parameters.
    return TruncatedNormalParams(mean=mean, stddev=stddev,
                                 low=-1.0, high=1.0, stddev_clip=stddev_clip)


# ----------------------------------------------------------------------------
# Pure-JAX reference (for the correctness check in the demo).
# ----------------------------------------------------------------------------
def _reference_forward(params, obs2d, action_dim, ln_eps=1e-5):
    h = obs2d @ params["wt"] + params["bt"]
    mu = h.mean(-1, keepdims=True)
    var = ((h - mu) ** 2).mean(-1, keepdims=True)
    h = (h - mu) / jnp.sqrt(var + ln_eps) * params["ln_g"] + params["ln_b"]
    h = jnp.tanh(h)
    z = jax.nn.relu(h @ params["w1"] + params["b1"])
    z = jax.nn.relu(z @ params["w2"] + params["b2"])
    out = z @ params["w3"] + params["b3"]
    mean_tanh, log_std = out[:, :action_dim], out[:, action_dim:]
    return jnp.tanh(mean_tanh), jnp.exp(log_std)


# ----------------------------------------------------------------------------
# Demo / smoke test.
# ----------------------------------------------------------------------------
if __name__ == "__main__":
    REPR_SHAPE = (4, 8, 8)        # repr_dim = 256
    FEATURE_DIM = 64
    HIDDEN_DIM = 64
    ACTION_DIM = 8
    B = 16
    BATCH_TILE = 8                # -> grid=(2,), exercises the batch pipeline

    root = jax.random.PRNGKey(0)
    k_params, k_obs = jax.random.split(root, 2)

    params = init_actor_params(k_params, REPR_SHAPE, FEATURE_DIM, HIDDEN_DIM,
                               ACTION_DIM, stddev_schedule=None)
    obs = jax.random.normal(k_obs, (B,) + REPR_SHAPE, jnp.float32)

    # ---- f32-operand run: tight check against the pure-JAX reference --------
    pi = truncated_gaussian_actor_forward(params, obs, action_dim=ACTION_DIM,
                                          batch_tile=BATCH_TILE,
                                          param_dtype=jnp.float32)
    jax.block_until_ready((pi.mean, pi.stddev))
    assert pi.mean.shape == (B, ACTION_DIM)
    assert pi.stddev.shape == (B, ACTION_DIM)
    assert bool(jnp.all(jnp.isfinite(pi.mean)))
    assert bool(jnp.all(pi.stddev > 0.0))
    assert bool(jnp.all(jnp.abs(pi.mean) <= 1.0))

    ref_mean, ref_std = _reference_forward(params, obs.reshape(B, -1), ACTION_DIM)
    assert bool(jnp.allclose(pi.mean, ref_mean, atol=1e-4, rtol=1e-4))
    assert bool(jnp.allclose(pi.stddev, ref_std, atol=1e-4, rtol=1e-4))

    # ---- default bf16-operand run (production path): sanity checks ----------
    pi_bf16 = truncated_gaussian_actor_forward(params, obs, action_dim=ACTION_DIM)
    jax.block_until_ready((pi_bf16.mean, pi_bf16.stddev))
    assert pi_bf16.mean.shape == (B, ACTION_DIM)
    assert pi_bf16.stddev.shape == (B, ACTION_DIM)
    assert bool(jnp.all(jnp.isfinite(pi_bf16.mean)))
    assert bool(jnp.all(jnp.abs(pi_bf16.mean) <= 1.0))
    assert bool(jnp.all(pi_bf16.stddev > 0.0))

    print("KERNEL_OK")
</pallas_src>

<mosaic_0001>
module attributes {stable_mosaic.version = 11 : i64} {
  func.func @_actor_kernel(%arg0: i32, %arg1: memref<8x256xf32, #tpu.memory_space<vmem>>, %arg2: memref<256x64xf32, #tpu.memory_space<vmem>>, %arg3: memref<1x64xf32, #tpu.memory_space<vmem>>, %arg4: memref<1x64xf32, #tpu.memory_space<vmem>>, %arg5: memref<1x64xf32, #tpu.memory_space<vmem>>, %arg6: memref<64x128xf32, #tpu.memory_space<vmem>>, %arg7: memref<1x128xf32, #tpu.memory_space<vmem>>, %arg8: memref<128x128xf32, #tpu.memory_space<vmem>>, %arg9: memref<1x128xf32, #tpu.memory_space<vmem>>, %arg10: memref<128x128xf32, #tpu.memory_space<vmem>>, %arg11: memref<1x128xf32, #tpu.memory_space<vmem>>, %arg12: memref<8x128xf32, #tpu.memory_space<vmem>>) attributes {dimension_semantics = [#tpu.dimension_semantics<parallel>], iteration_bounds = array<i64: 2>, scalar_prefetch = 0 : i64, scratch_operands = 0 : i64, tpu.core_type = #tpu.core_type<tc>, window_params = [{transform_indices = @transform_0, window_bounds = array<i64: 8, 256>}, {pipeline_mode = #tpu.pipeline_mode<synchronous>, transform_indices = @transform_1, window_bounds = array<i64: 256, 64>}, {pipeline_mode = #tpu.pipeline_mode<synchronous>, transform_indices = @transform_2, window_bounds = array<i64: 1, 64>}, {pipeline_mode = #tpu.pipeline_mode<synchronous>, transform_indices = @transform_3, window_bounds = array<i64: 1, 64>}, {pipeline_mode = #tpu.pipeline_mode<synchronous>, transform_indices = @transform_4, window_bounds = array<i64: 1, 64>}, {pipeline_mode = #tpu.pipeline_mode<synchronous>, transform_indices = @transform_5, window_bounds = array<i64: 64, 128>}, {pipeline_mode = #tpu.pipeline_mode<synchronous>, transform_indices = @transform_6, window_bounds = array<i64: 1, 128>}, {pipeline_mode = #tpu.pipeline_mode<synchronous>, transform_indices = @transform_7, window_bounds = array<i64: 128, 128>}, {pipeline_mode = #tpu.pipeline_mode<synchronous>, transform_indices = @transform_8, window_bounds = array<i64: 1, 128>}, {pipeline_mode = #tpu.pipeline_mode<synchronous>, transform_indices = @transform_9, window_bounds = array<i64: 128, 128>}, {pipeline_mode = #tpu.pipeline_mode<synchronous>, transform_indices = @transform_10, window_bounds = array<i64: 1, 128>}, {transform_indices = @transform_11, window_bounds = array<i64: 8, 128>}]} {
    %c0 = arith.constant 0 : index
    %c0_0 = arith.constant 0 : index
    %0 = vector.load %arg1[%c0, %c0_0] : memref<8x256xf32, #tpu.memory_space<vmem>>, vector<8x256xf32>
    %c0_1 = arith.constant 0 : index
    %c0_2 = arith.constant 0 : index
    %1 = vector.load %arg2[%c0_1, %c0_2] : memref<256x64xf32, #tpu.memory_space<vmem>>, vector<256x64xf32>
    %cst = arith.constant dense<0.000000e+00> : vector<8x64xf32>
    %2 = tpu.matmul %0, %1, %cst {dimension_numbers = #tpu.dot_dimension_numbers<[1], [0], [0], [1], [0, 0, 1, 1], [], []>} : vector<8x256xf32>, vector<256x64xf32>, vector<8x64xf32> -> vector<8x64xf32>
    %c0_3 = arith.constant 0 : index
    %c0_4 = arith.constant 0 : index
    %3 = vector.load %arg3[%c0_3, %c0_4] : memref<1x64xf32, #tpu.memory_space<vmem>>, vector<1x64xf32>
    %4 = vector.broadcast %3 : vector<1x64xf32> to vector<8x64xf32>
    %5 = arith.addf %2, %4 : vector<8x64xf32>
    %cst_5 = arith.constant dense<0.000000e+00> : vector<8xf32>
    %6 = vector.multi_reduction <add>, %5, %cst_5 [1] : vector<8x64xf32> to vector<8xf32>
    %7 = vector.shape_cast %6 : vector<8xf32> to vector<8x1xf32>
    %cst_6 = arith.constant 6.400000e+01 : f32
    %8 = vector.broadcast %cst_6 : f32 to vector<8x1xf32>
    %9 = arith.divf %7, %8 : vector<8x1xf32>
    %10 = vector.broadcast %9 : vector<8x1xf32> to vector<8x64xf32>
    %11 = arith.subf %5, %10 : vector<8x64xf32>
    %12 = arith.mulf %11, %11 : vector<8x64xf32>
    %cst_7 = arith.constant dense<0.000000e+00> : vector<8xf32>
    %13 = vector.multi_reduction <add>, %12, %cst_7 [1] : vector<8x64xf32> to vector<8xf32>
    %14 = vector.shape_cast %13 : vector<8xf32> to vector<8x1xf32>
    %cst_8 = arith.constant 6.400000e+01 : f32
    %15 = vector.broadcast %cst_8 : f32 to vector<8x1xf32>
    %16 = arith.divf %14, %15 : vector<8x1xf32>
    %cst_9 = arith.constant 9.99999974E-6 : f32
    %17 = vector.broadcast %cst_9 : f32 to vector<8x1xf32>
    %18 = arith.addf %16, %17 : vector<8x1xf32>
    %19 = math.rsqrt %18 : vector<8x1xf32>
    %20 = vector.broadcast %19 : vector<8x1xf32> to vector<8x64xf32>
    %21 = arith.mulf %11, %20 : vector<8x64xf32>
    %c0_10 = arith.constant 0 : index
    %c0_11 = arith.constant 0 : index
    %22 = vector.load %arg4[%c0_10, %c0_11] : memref<1x64xf32, #tpu.memory_space<vmem>>, vector<1x64xf32>
    %23 = vector.broadcast %22 : vector<1x64xf32> to vector<8x64xf32>
    %24 = arith.mulf %21, %23 : vector<8x64xf32>
    %c0_12 = arith.constant 0 : index
    %c0_13 = arith.constant 0 : index
    %25 = vector.load %arg5[%c0_12, %c0_13] : memref<1x64xf32, #tpu.memory_space<vmem>>, vector<1x64xf32>
    %26 = vector.broadcast %25 : vector<1x64xf32> to vector<8x64xf32>
    %27 = arith.addf %24, %26 : vector<8x64xf32>
    %28 = math.tanh %27 : vector<8x64xf32>
    %c0_14 = arith.constant 0 : index
    %c0_15 = arith.constant 0 : index
    %29 = vector.load %arg6[%c0_14, %c0_15] : memref<64x128xf32, #tpu.memory_space<vmem>>, vector<64x128xf32>
    %cst_16 = arith.constant dense<0.000000e+00> : vector<8x128xf32>
    %30 = tpu.matmul %28, %29, %cst_16 {dimension_numbers = #tpu.dot_dimension_numbers<[1], [0], [0], [1], [0, 0, 1, 1], [], []>} : vector<8x64xf32>, vector<64x128xf32>, vector<8x128xf32> -> vector<8x128xf32>
    %c0_17 = arith.constant 0 : index
    %c0_18 = arith.constant 0 : index
    %31 = vector.load %arg7[%c0_17, %c0_18] : memref<1x128xf32, #tpu.memory_space<vmem>>, vector<1x128xf32>
    %32 = vector.broadcast %31 : vector<1x128xf32> to vector<8x128xf32>
    %33 = arith.addf %30, %32 : vector<8x128xf32>
    %cst_19 = arith.constant 0.000000e+00 : f32
    %34 = vector.broadcast %cst_19 : f32 to vector<8x128xf32>
    %35 = arith.maximumf %33, %34 : vector<8x128xf32>
    %c0_20 = arith.constant 0 : index
    %c0_21 = arith.constant 0 : index
    %36 = vector.load %arg8[%c0_20, %c0_21] : memref<128x128xf32, #tpu.memory_space<vmem>>, vector<128x128xf32>
    %cst_22 = arith.constant dense<0.000000e+00> : vector<8x128xf32>
    %37 = tpu.matmul %35, %36, %cst_22 {dimension_numbers = #tpu.dot_dimension_numbers<[1], [0], [0], [1], [0, 0, 1, 1], [], []>} : vector<8x128xf32>, vector<128x128xf32>, vector<8x128xf32> -> vector<8x128xf32>
    %c0_23 = arith.constant 0 : index
    %c0_24 = arith.constant 0 : index
    %38 = vector.load %arg9[%c0_23, %c0_24] : memref<1x128xf32, #tpu.memory_space<vmem>>, vector<1x128xf32>
    %39 = vector.broadcast %38 : vector<1x128xf32> to vector<8x128xf32>
    %40 = arith.addf %37, %39 : vector<8x128xf32>
    %cst_25 = arith.constant 0.000000e+00 : f32
    %41 = vector.broadcast %cst_25 : f32 to vector<8x128xf32>
    %42 = arith.maximumf %40, %41 : vector<8x128xf32>
    %c0_26 = arith.constant 0 : index
    %c0_27 = arith.constant 0 : index
    %43 = vector.load %arg10[%c0_26, %c0_27] : memref<128x128xf32, #tpu.memory_space<vmem>>, vector<128x128xf32>
    %cst_28 = arith.constant dense<0.000000e+00> : vector<8x128xf32>
    %44 = tpu.matmul %42, %43, %cst_28 {dimension_numbers = #tpu.dot_dimension_numbers<[1], [0], [0], [1], [0, 0, 1, 1], [], []>} : vector<8x128xf32>, vector<128x128xf32>, vector<8x128xf32> -> vector<8x128xf32>
    %c0_29 = arith.constant 0 : index
    %c0_30 = arith.constant 0 : index
    %45 = vector.load %arg11[%c0_29, %c0_30] : memref<1x128xf32, #tpu.memory_space<vmem>>, vector<1x128xf32>
    %46 = vector.broadcast %45 : vector<1x128xf32> to vector<8x128xf32>
    %47 = arith.addf %44, %46 : vector<8x128xf32>
    %48 = tpu.iota {dimensions = array<i32: 1>} : vector<8x128xi32>
    %c8_i32 = arith.constant 8 : i32
    %49 = vector.broadcast %c8_i32 : i32 to vector<8x128xi32>
    %50 = arith.cmpi slt, %48, %49 : vector<8x128xi32>
    %51 = math.tanh %47 : vector<8x128xf32>
    %52 = math.exp %47 : vector<8x128xf32>
    %53 = arith.select %50, %51, %52 : vector<8x128xi1>, vector<8x128xf32>
    %c0_31 = arith.constant 0 : index
    %c0_32 = arith.constant 0 : index
    %54 = vector.load %arg12[%c0_31, %c0_32] : memref<8x128xf32, #tpu.memory_space<vmem>>, vector<8x128xf32>
    tpu.vector_store %arg12[%c0_31, %c0_32], %53 {strides = array<i32>} : memref<8x128xf32, #tpu.memory_space<vmem>>, vector<8x128xf32>,
    return
  }
  func.func @transform_0(%arg0: i32) -> (i32, i32) {
    %c0_i32 = arith.constant 0 : i32
    %c0_i32_0 = arith.constant 0 : i32
    return %arg0, %c0_i32 : i32, i32
  }
  func.func @transform_1(%arg0: i32) -> (i32, i32) {
    %c0_i32 = arith.constant 0 : i32
    %c0_i32_0 = arith.constant 0 : i32
    %c0_i32_1 = arith.constant 0 : i32
    return %c0_i32, %c0_i32_0 : i32, i32
  }
  func.func @transform_2(%arg0: i32) -> (i32, i32) {
    %c0_i32 = arith.constant 0 : i32
    %c0_i32_0 = arith.constant 0 : i32
    %c0_i32_1 = arith.constant 0 : i32
    return %c0_i32, %c0_i32_0 : i32, i32
  }
  func.func @transform_3(%arg0: i32) -> (i32, i32) {
    %c0_i32 = arith.constant 0 : i32
    %c0_i32_0 = arith.constant 0 : i32
    %c0_i32_1 = arith.constant 0 : i32
    return %c0_i32, %c0_i32_0 : i32, i32
  }
  func.func @transform_4(%arg0: i32) -> (i32, i32) {
    %c0_i32 = arith.constant 0 : i32
    %c0_i32_0 = arith.constant 0 : i32
    %c0_i32_1 = arith.constant 0 : i32
    return %c0_i32, %c0_i32_0 : i32, i32
  }
  func.func @transform_5(%arg0: i32) -> (i32, i32) {
    %c0_i32 = arith.constant 0 : i32
    %c0_i32_0 = arith.constant 0 : i32
    %c0_i32_1 = arith.constant 0 : i32
    return %c0_i32, %c0_i32_0 : i32, i32
  }
  func.func @transform_6(%arg0: i32) -> (i32, i32) {
    %c0_i32 = arith.constant 0 : i32
    %c0_i32_0 = arith.constant 0 : i32
    %c0_i32_1 = arith.constant 0 : i32
    return %c0_i32, %c0_i32_0 : i32, i32
  }
  func.func @transform_7(%arg0: i32) -> (i32, i32) {
    %c0_i32 = arith.constant 0 : i32
    %c0_i32_0 = arith.constant 0 : i32
    %c0_i32_1 = arith.constant 0 : i32
    return %c0_i32, %c0_i32_0 : i32, i32
  }
  func.func @transform_8(%arg0: i32) -> (i32, i32) {
    %c0_i32 = arith.constant 0 : i32
    %c0_i32_0 = arith.constant 0 : i32
    %c0_i32_1 = arith.constant 0 : i32
    return %c0_i32, %c0_i32_0 : i32, i32
  }
  func.func @transform_9(%arg0: i32) -> (i32, i32) {
    %c0_i32 = arith.constant 0 : i32
    %c0_i32_0 = arith.constant 0 : i32
    %c0_i32_1 = arith.constant 0 : i32
    return %c0_i32, %c0_i32_0 : i32, i32
  }
  func.func @transform_10(%arg0: i32) -> (i32, i32) {
    %c0_i32 = arith.constant 0 : i32
    %c0_i32_0 = arith.constant 0 : i32
    %c0_i32_1 = arith.constant 0 : i32
    return %c0_i32, %c0_i32_0 : i32, i32
  }
  func.func @transform_11(%arg0: i32) -> (i32, i32) {
    %c0_i32 = arith.constant 0 : i32
    %c0_i32_0 = arith.constant 0 : i32
    return %arg0, %c0_i32 : i32, i32
  }
}

module attributes {stable_mosaic.version = 11 : i64} {
  func.func @_actor_kernel(%arg0: i32, %arg1: memref<8x256xf32, #tpu.memory_space<vmem>>, %arg2: memref<256x64xf32, #tpu.memory_space<vmem>>, %arg3: memref<1x64xf32, #tpu.memory_space<vmem>>, %arg4: memref<1x64xf32, #tpu.memory_space<vmem>>, %arg5: memref<1x64xf32, #tpu.memory_space<vmem>>, %arg6: memref<64x128xf32, #tpu.memory_space<vmem>>, %arg7: memref<1x128xf32, #tpu.memory_space<vmem>>, %arg8: memref<128x128xf32, #tpu.memory_space<vmem>>, %arg9: memref<1x128xf32, #tpu.memory_space<vmem>>, %arg10: memref<128x128xf32, #tpu.memory_space<vmem>>, %arg11: memref<1x128xf32, #tpu.memory_space<vmem>>, %arg12: memref<8x128xf32, #tpu.memory_space<vmem>>) attributes {dimension_semantics = [#tpu.dimension_semantics<parallel>], iteration_bounds = array<i64: 2>, scalar_prefetch = 0 : i64, scratch_operands = 0 : i64, tpu.core_type = #tpu.core_type<tc>, window_params = [{transform_indices = @transform_0, window_bounds = array<i64: 8, 256>}, {pipeline_mode = #tpu.pipeline_mode<synchronous>, transform_indices = @transform_1, window_bounds = array<i64: 256, 64>}, {pipeline_mode = #tpu.pipeline_mode<synchronous>, transform_indices = @transform_2, window_bounds = array<i64: 1, 64>}, {pipeline_mode = #tpu.pipeline_mode<synchronous>, transform_indices = @transform_3, window_bounds = array<i64: 1, 64>}, {pipeline_mode = #tpu.pipeline_mode<synchronous>, transform_indices = @transform_4, window_bounds = array<i64: 1, 64>}, {pipeline_mode = #tpu.pipeline_mode<synchronous>, transform_indices = @transform_5, window_bounds = array<i64: 64, 128>}, {pipeline_mode = #tpu.pipeline_mode<synchronous>, transform_indices = @transform_6, window_bounds = array<i64: 1, 128>}, {pipeline_mode = #tpu.pipeline_mode<synchronous>, transform_indices = @transform_7, window_bounds = array<i64: 128, 128>}, {pipeline_mode = #tpu.pipeline_mode<synchronous>, transform_indices = @transform_8, window_bounds = array<i64: 1, 128>}, {pipeline_mode = #tpu.pipeline_mode<synchronous>, transform_indices = @transform_9, window_bounds = array<i64: 128, 128>}, {pipeline_mode = #tpu.pipeline_mode<synchronous>, transform_indices = @transform_10, window_bounds = array<i64: 1, 128>}, {transform_indices = @transform_11, window_bounds = array<i64: 8, 128>}]} {
    %c0 = arith.constant 0 : index
    %c0_0 = arith.constant 0 : index
    %0 = vector.load %arg1[%c0, %c0_0] : memref<8x256xf32, #tpu.memory_space<vmem>>, vector<8x256xf32>
    %c0_1 = arith.constant 0 : index
    %c0_2 = arith.constant 0 : index
    %1 = vector.load %arg2[%c0_1, %c0_2] : memref<256x64xf32, #tpu.memory_space<vmem>>, vector<256x64xf32>
    %cst = arith.constant dense<0.000000e+00> : vector<8x64xf32>
    %2 = tpu.matmul %0, %1, %cst {dimension_numbers = #tpu.dot_dimension_numbers<[1], [0], [0], [1], [0, 0, 1, 1], [], []>} : vector<8x256xf32>, vector<256x64xf32>, vector<8x64xf32> -> vector<8x64xf32>
    %c0_3 = arith.constant 0 : index
    %c0_4 = arith.constant 0 : index
    %3 = vector.load %arg3[%c0_3, %c0_4] : memref<1x64xf32, #tpu.memory_space<vmem>>, vector<1x64xf32>
    %4 = vector.broadcast %3 : vector<1x64xf32> to vector<8x64xf32>
    %5 = arith.addf %2, %4 : vector<8x64xf32>
    %cst_5 = arith.constant dense<0.000000e+00> : vector<8xf32>
    %6 = vector.multi_reduction <add>, %5, %cst_5 [1] : vector<8x64xf32> to vector<8xf32>
    %7 = vector.shape_cast %6 : vector<8xf32> to vector<8x1xf32>
    %cst_6 = arith.constant 6.400000e+01 : f32
    %8 = vector.broadcast %cst_6 : f32 to vector<8x1xf32>
    %9 = arith.divf %7, %8 : vector<8x1xf32>
    %10 = vector.broadcast %9 : vector<8x1xf32> to vector<8x64xf32>
    %11 = arith.subf %5, %10 : vector<8x64xf32>
    %12 = arith.mulf %11, %11 : vector<8x64xf32>
    %cst_7 = arith.constant dense<0.000000e+00> : vector<8xf32>
    %13 = vector.multi_reduction <add>, %12, %cst_7 [1] : vector<8x64xf32> to vector<8xf32>
    %14 = vector.shape_cast %13 : vector<8xf32> to vector<8x1xf32>
    %cst_8 = arith.constant 6.400000e+01 : f32
    %15 = vector.broadcast %cst_8 : f32 to vector<8x1xf32>
    %16 = arith.divf %14, %15 : vector<8x1xf32>
    %cst_9 = arith.constant 9.99999974E-6 : f32
    %17 = vector.broadcast %cst_9 : f32 to vector<8x1xf32>
    %18 = arith.addf %16, %17 : vector<8x1xf32>
    %19 = math.rsqrt %18 : vector<8x1xf32>
    %20 = vector.broadcast %19 : vector<8x1xf32> to vector<8x64xf32>
    %21 = arith.mulf %11, %20 : vector<8x64xf32>
    %c0_10 = arith.constant 0 : index
    %c0_11 = arith.constant 0 : index
    %22 = vector.load %arg4[%c0_10, %c0_11] : memref<1x64xf32, #tpu.memory_space<vmem>>, vector<1x64xf32>
    %23 = vector.broadcast %22 : vector<1x64xf32> to vector<8x64xf32>
    %24 = arith.mulf %21, %23 : vector<8x64xf32>
    %c0_12 = arith.constant 0 : index
    %c0_13 = arith.constant 0 : index
    %25 = vector.load %arg5[%c0_12, %c0_13] : memref<1x64xf32, #tpu.memory_space<vmem>>, vector<1x64xf32>
    %26 = vector.broadcast %25 : vector<1x64xf32> to vector<8x64xf32>
    %27 = arith.addf %24, %26 : vector<8x64xf32>
    %28 = math.tanh %27 : vector<8x64xf32>
    %c0_14 = arith.constant 0 : index
    %c0_15 = arith.constant 0 : index
    %29 = vector.load %arg6[%c0_14, %c0_15] : memref<64x128xf32, #tpu.memory_space<vmem>>, vector<64x128xf32>
    %cst_16 = arith.constant dense<0.000000e+00> : vector<8x128xf32>
    %30 = tpu.matmul %28, %29, %cst_16 {dimension_numbers = #tpu.dot_dimension_numbers<[1], [0], [0], [1], [0, 0, 1, 1], [], []>} : vector<8x64xf32>, vector<64x128xf32>, vector<8x128xf32> -> vector<8x128xf32>
    %c0_17 = arith.constant 0 : index
    %c0_18 = arith.constant 0 : index
    %31 = vector.load %arg7[%c0_17, %c0_18] : memref<1x128xf32, #tpu.memory_space<vmem>>, vector<1x128xf32>
    %32 = vector.broadcast %31 : vector<1x128xf32> to vector<8x128xf32>
    %33 = arith.addf %30, %32 : vector<8x128xf32>
    %cst_19 = arith.constant 0.000000e+00 : f32
    %34 = vector.broadcast %cst_19 : f32 to vector<8x128xf32>
    %35 = arith.maximumf %33, %34 : vector<8x128xf32>
    %c0_20 = arith.constant 0 : index
    %c0_21 = arith.constant 0 : index
    %36 = vector.load %arg8[%c0_20, %c0_21] : memref<128x128xf32, #tpu.memory_space<vmem>>, vector<128x128xf32>
    %cst_22 = arith.constant dense<0.000000e+00> : vector<8x128xf32>
    %37 = tpu.matmul %35, %36, %cst_22 {dimension_numbers = #tpu.dot_dimension_numbers<[1], [0], [0], [1], [0, 0, 1, 1], [], []>} : vector<8x128xf32>, vector<128x128xf32>, vector<8x128xf32> -> vector<8x128xf32>
    %c0_23 = arith.constant 0 : index
    %c0_24 = arith.constant 0 : index
    %38 = vector.load %arg9[%c0_23, %c0_24] : memref<1x128xf32, #tpu.memory_space<vmem>>, vector<1x128xf32>
    %39 = vector.broadcast %38 : vector<1x128xf32> to vector<8x128xf32>
    %40 = arith.addf %37, %39 : vector<8x128xf32>
    %cst_25 = arith.constant 0.000000e+00 : f32
    %41 = vector.broadcast %cst_25 : f32 to vector<8x128xf32>
    %42 = arith.maximumf %40, %41 : vector<8x128xf32>
    %c0_26 = arith.constant 0 : index
    %c0_27 = arith.constant 0 : index
    %43 = vector.load %arg10[%c0_26, %c0_27] : memref<128x128xf32, #tpu.memory_space<vmem>>, vector<128x128xf32>
    %cst_28 = arith.constant dense<0.000000e+00> : vector<8x128xf32>
    %44 = tpu.matmul %42, %43, %cst_28 {dimension_numbers = #tpu.dot_dimension_numbers<[1], [0], [0], [1], [0, 0, 1, 1], [], []>} : vector<8x128xf32>, vector<128x128xf32>, vector<8x128xf32> -> vector<8x128xf32>
    %c0_29 = arith.constant 0 : index
    %c0_30 = arith.constant 0 : index
    %45 = vector.load %arg11[%c0_29, %c0_30] : memref<1x128xf32, #tpu.memory_space<vmem>>, vector<1x128xf32>
    %46 = vector.broadcast %45 : vector<1x128xf32> to vector<8x128xf32>
    %47 = arith.addf %44, %46 : vector<8x128xf32>
    %48 = tpu.iota {dimensions = array<i32: 1>} : vector<8x128xi32>
    %c8_i32 = arith.constant 8 : i32
    %49 = vector.broadcast %c8_i32 : i32 to vector<8x128xi32>
    %50 = arith.cmpi slt, %48, %49 : vector<8x128xi32>
    %51 = math.tanh %47 : vector<8x128xf32>
    %52 = math.exp %47 : vector<8x128xf32>
    %53 = arith.select %50, %51, %52 : vector<8x128xi1>, vector<8x128xf32>
    %c0_31 = arith.constant 0 : index
    %c0_32 = arith.constant 0 : index
    %54 = vector.load %arg12[%c0_31, %c0_32] : memref<8x128xf32, #tpu.memory_space<vmem>>, vector<8x128xf32>
    tpu.vector_store %arg12[%c0_31, %c0_32], %53 {strides = array<i32>} : memref<8x128xf32, #tpu.memory_space<vmem>>, vector<8x128xf32>,
    return
  }
  func.func @transform_0(%arg0: i32) -> (i32, i32) {
    %c0_i32 = arith.constant 0 : i32
    %c0_i32_0 = arith.constant 0 : i32
    return %arg0, %c0_i32 : i32, i32
  }
  func.func @transform_1(%arg0: i32) -> (i32, i32) {
    %c0_i32 = arith.constant 0 : i32
    %c0_i32_0 = arith.constant 0 : i32
    %c0_i32_1 = arith.constant 0 : i32
    return %c0_i32, %c0_i32_0 : i32, i32
  }
  func.func @transform_2(%arg0: i32) -> (i32, i32) {
    %c0_i32 = arith.constant 0 : i32
    %c0_i32_0 = arith.constant 0 : i32
    %c0_i32_1 = arith.constant 0 : i32
    return %c0_i32, %c0_i32_0 : i32, i32
  }
  func.func @transform_3(%arg0: i32) -> (i32, i32) {
    %c0_i32 = arith.constant 0 : i32
    %c0_i32_0 = arith.constant 0 : i32
    %c0_i32_1 = arith.constant 0 : i32
    return %c0_i32, %c0_i32_0 : i32, i32
  }
  func.func @transform_4(%arg0: i32) -> (i32, i32) {
    %c0_i32 = arith.constant 0 : i32
    %c0_i32_0 = arith.constant 0 : i32
    %c0_i32_1 = arith.constant 0 : i32
    return %c0_i32, %c0_i32_0 : i32, i32
  }
  func.func @transform_5(%arg0: i32) -> (i32, i32) {
    %c0_i32 = arith.constant 0 : i32
    %c0_i32_0 = arith.constant 0 : i32
    %c0_i32_1 = arith.constant 0 : i32
    return %c0_i32, %c0_i32_0 : i32, i32
  }
  func.func @transform_6(%arg0: i32) -> (i32, i32) {
    %c0_i32 = arith.constant 0 : i32
    %c0_i32_0 = arith.constant 0 : i32
    %c0_i32_1 = arith.constant 0 : i32
    return %c0_i32, %c0_i32_0 : i32, i32
  }
  func.func @transform_7(%arg0: i32) -> (i32, i32) {
    %c0_i32 = arith.constant 0 : i32
    %c0_i32_0 = arith.constant 0 : i32
    %c0_i32_1 = arith.constant 0 : i32
    return %c0_i32, %c0_i32_0 : i32, i32
  }
  func.func @transform_8(%arg0: i32) -> (i32, i32) {
    %c0_i32 = arith.constant 0 : i32
    %c0_i32_0 = arith.constant 0 : i32
    %c0_i32_1 = arith.constant 0 : i32
    return %c0_i32, %c0_i32_0 : i32, i32
  }
  func.func @transform_9(%arg0: i32) -> (i32, i32) {
    %c0_i32 = arith.constant 0 : i32
    %c0_i32_0 = arith.constant 0 : i32
    %c0_i32_1 = arith.constant 0 : i32
    return %c0_i32, %c0_i32_0 : i32, i32
  }
  func.func @transform_10(%arg0: i32) -> (i32, i32) {
    %c0_i32 = arith.constant 0 : i32
    %c0_i32_0 = arith.constant 0 : i32
    %c0_i32_1 = arith.constant 0 : i32
    return %c0_i32, %c0_i32_0 : i32, i32
  }
  func.func @transform_11(%arg0: i32) -> (i32, i32) {
    %c0_i32 = arith.constant 0 : i32
    %c0_i32_0 = arith.constant 0 : i32
    return %arg0, %c0_i32 : i32, i32
  }
}

</mosaic_0001>

<bundles_post_ra>
// kernel: tpu_custom_call.1
= control target key start
LH: loop header
LB: loop body
LE: loop exit
PB: predicated region body
PF: predicated region fallthrough
CT: control target
= control target key end

     0   :  { %16 = vsyncpa [#allocation3], 0  ;;  %s1625_s0 = inlined_call_operand.vmem [shape: f32[16,256], index: 0, kind: input, shape index: {}]   ;;  %s1626_s1 = inlined_call_operand.vmem [shape: f32[256,64], index: 1, kind: input, shape index: {}]   ;;  %s1627_s2 = inlined_call_operand.vmem [shape: f32[1,64], index: 2, kind: input, shape index: {}]   ;;  %s1628_s3 = inlined_call_operand.vmem [shape: f32[1,64], index: 3, kind: input, shape index: {}]   ;;  %s1629_s4 = inlined_call_operand.vmem [shape: f32[1,64], index: 4, kind: input, shape index: {}]   ;;  %s1630_s5 = inlined_call_operand.vmem [shape: f32[64,128], index: 5, kind: input, shape index: {}]   ;;  %s1631_s6 = inlined_call_operand.vmem [shape: f32[1,128], index: 6, kind: input, shape index: {}]   ;;  %s1632_s7 = inlined_call_operand.vmem [shape: f32[128,128], index: 7, kind: input, shape index: {}]   ;;  %s1633_s8 = inlined_call_operand.vmem [shape: f32[1,128], index: 8, kind: input, shape index: {}]   ;;  %s1634_s9 = inlined_call_operand.vmem [shape: f32[128,128], index: 9, kind: input, shape index: {}]   ;;  %s1635_s10 = inlined_call_operand.vmem [shape: f32[1,128], index: 10, kind: input, shape index: {}]   ;;  %s1636_s11 = inlined_call_operand.hbm [shape: f32[16,128], index: 11, kind: output, shape index: {}]  }
   0x1   :  { %18 = vsyncpa [#allocation3 + $0x1], 0  ;;  %s1245_s17 = smov 0   ;;  %s1247_s18 = smov 0  }
   0x2   :  { %s1249_s19 = smov 0   ;;  %s1251_s20 = smov 0  }
   0x3 LB: > { %1638 = sst [smem:[#allocation5_spill]] %s1176_s19  ;;  %s1266_s21 = sadd.s32 4294967295, %s1180_s20   ;;  %s1180_s20 = sphi %s1251_s20, %s1646_s20   ;;  %s1176_s19 = sphi %s1249_s19, %s1643_s19   ;;  %s1172_s18 = sphi %s1247_s18, %s1645_s18   ;;  %s1168_s17 = sphi %s1245_s17, %s1644_s17  }
   0x4   : > { %s885_s22 = sadd.s32 4294967294, %s1180_s20   ;;  %s1270_s23 = sadd.s32 1, %s1180_s20  }
   0x5   : > { %s267_s24 = sadd.s32 1, %s1176_s19  ;;  %s264_s25 = ssub.s32 %s1180_s20, %s1270_s23 }
   0x6   : > { %p277_p0 = scmp.ne.s32.totalorder %s1176_s19, %s1172_s18  ;;  %p265_p1 = scmp.eq.s32.totalorder %s264_s25, 0 }
   0x7   : > { %p278_p2 = scmp.eq.s32.totalorder %s1266_s21, 1  ;;  %p283_p3 = scmp.ne.s32.totalorder %s1172_s18, %s1168_s17 }
   0x8   : > { %p284_p4 = scmp.eq.s32.totalorder %s885_s22, 1  ;;  %p888_p7 = scmp.ge.s32.totalorder %s1180_s20, 1 }
   0x9   : > { %s1281_s26 = scalar_select %p265_p1, %s1176_s19, %s267_s24  }
   0xa   : > { %p1283_p5 = por %p278_p2, %p277_p0  ;;  %p1287_p6 = por %p284_p4, %p283_p3 }
   0xb   : > { %1639 = sst [smem:[#allocation6_spill]] %s1281_s26  ;;  %p340_p8 = scmp.lt.s32.totalorder %s1180_s20, 3 }
   0xd   : > { %p341_p9 = pnand %p888_p7, %p340_p8 }
   0xe   : > { %p380_p10 = scmp.lt.s32.totalorder (!%p341_p9), %s1266_s21, 1  ;;  %s900_s30 = sshll.u32 (!%p341_p9), %s1266_s21, 7 }
   0xf   : > { %344 = sbr.rel (%p341_p9) target bundleno = 1193 (0x4a9), region = 64  ;;  %s1590_s16 = scalar_lea.hbm (!%p341_p9), %s1636_s11, %s900_s30 }
  0x14   : > { %v418_v0 = vld [vmem:[%s1626_s1 + $0xf8] sm:$0xff]  ;;  %v417_v2 = vld [vmem:[%s1626_s1 + $0xf0] sm:$0xff]  ;;  %v416_v4 = vld [vmem:[%s1626_s1 + $0xe8] sm:$0xff]  ;;  %s381_s29 = scalar_select %p380_p10, %s1266_s21, 1  ;;  %vm496_vm0 = vcmask 523264   ;;  %v1182_v45 = vmov 0.0  }
  0x15   : > { %v402_v1 = vld [vmem:[%s1626_s1 + $0x78] sm:$0xff]  ;;  %904 = vmatprep.subr.mxu0 %v418_v0  ;;  %v401_v3 = vld [vmem:[%s1626_s1 + $0x70] sm:$0xff]  ;;  %v400_v5 = vld [vmem:[%s1626_s1 + $0x68] sm:$0xff]  ;;  %982 = vmatprep.subr.mxu1 %v1182_v45  ;;  %vm1183_vm1 = vmmov 0   ;;  %s1184_s21 = smov [#allocation2]  }
  0x16   : > { %905 = vmatpush3.msra.mxu0 %v402_v1  ;;  %v415_v6 = vld [vmem:[%s1626_s1 + $0xe0] sm:$0xff]  ;;  %s903_s15 = sshll.u32 %s381_s29, 4  ;;  %v414_v8 = vld [vmem:[%s1626_s1 + $0xd8] sm:$0xff]  ;;  %v413_v10 = vld [vmem:[%s1626_s1 + $0xd0] sm:$0xff]  ;;  %998 = vmatprep.mubr.msk.f32.mxu1 %vm1183_vm1, %v1182_v45  ;;  %s1124_s26 = sshll.u32 %s1184_s21, 4  ;;  %s1125_s26 = int_to_ptr.vmem [resolvable:$false] %s1124_s26 }
  0x17   : > { %906 = vmatprep.subr.mxu0 %v417_v2  ;;  %v399_v7 = vld [vmem:[%s1626_s1 + $0x60] sm:$0xff]  ;;  %v398_v9 = vld [vmem:[%s1626_s1 + $0x58] sm:$0xff]  ;;  %s1328_s13 = scalar_lea.vmem %s1625_s0, %s903_s15  ;;  %v397_v11 = vld [vmem:[%s1626_s1 + $0x50] sm:$0xff]  ;;  %s377_s15 = sand.u32 1, %s1172_s18  }
  0x18   : > { %907 = vmatpush3.msra.mxu0 %v401_v3  ;;  %v412_v12 = vld [vmem:[%s1626_s1 + $0xc8] sm:$0xff]  ;;  %v411_v15 = vld [vmem:[%s1626_s1 + $0xc0] sm:$0xff]  ;;  %v410_v17 = vld [vmem:[%s1626_s1 + $0xb8] sm:$0xff]  ;;  %s889_s25 = sshll.u32 %s377_s15, 3  ;;  %s813_s22 = scalar_lea.sflag [#allocation3], %s377_s15 }
  0x19   : > { %908 = vmatprep.subr.mxu0 %v416_v4  ;;  %v386_v13 = vld [vmem:[%s1328_s13 + $0x8] sm:$0xff]  ;;  %v395_v16 = vld [vmem:[%s1626_s1 + $0x40] sm:$0xff]  ;;  %v394_v18 = vld [vmem:[%s1626_s1 + $0x38] sm:$0xff]  ;;  %s379_s12 = scalar_lea.vmem [#allocation2], %s889_s25  ;;  %s1126_s19 = scalar_lea.vmem %s1125_s26, 256 }
  0x1a   : > { %909 = vmatpush3.msra.mxu0 %v400_v5  ;;  %v396_v14 = vld [vmem:[%s1626_s1 + $0x48] sm:$0xff]  ;;  %490 = vmatprep.mubr.f32.mxu0 %v386_v13  ;;  %v409_v19 = vld [vmem:[%s1626_s1 + $0xb0] sm:$0xff]  ;;  %v407_v23 = vld [vmem:[%s1626_s1 + $0xa0] sm:$0xff]  ;;  %s826_s29 = sshll.u32 %s379_s12, 4  ;;  %s827_s29 = int_to_ptr.vmem [resolvable:$true] %s826_s29 }
  0x1b   : > { %910 = vmatprep.subr.mxu0 %v415_v6  ;;  %v393_v20 = vld [vmem:[%s1626_s1 + $0x30] sm:$0xff]  ;;  %v408_v21 = vld [vmem:[%s1626_s1 + $0xa8] sm:$0xff]  ;;  %v391_v24 = vld [vmem:[%s1626_s1 + $0x20] sm:$0xff]  ;;  %s1120_s24 = scalar_lea.vmem %s827_s29, 128  ;;  %p1127_p0 = scmp.lt.s32.totalorder %s827_s29, %s1125_s26 }
  0x1c   : > { %911 = vmatpush3.msra.mxu0 %v399_v7  ;;  %v392_v22 = vld [vmem:[%s1626_s1 + $0x28] sm:$0xff]  ;;  %v406_v25 = vld [vmem:[%s1626_s1 + $0x98] sm:$0xff]  ;;  %v405_v27 = vld [vmem:[%s1626_s1 + $0x90] sm:$0xff]  ;;  %p1121_p11 = scmp.ne.s32.totalorder %s827_s29, %s1120_s24  ;;  %p1128_p1 = scmp.lt.s32.totalorder %s1126_s19, %s1120_s24 }
  0x1d   : > { %912 = vmatprep.subr.mxu0 %v414_v8  ;;  %v390_v26 = vld [vmem:[%s1626_s1 + $0x18] sm:$0xff]  ;;  %v389_v28 = vld [vmem:[%s1626_s1 + $0x10] sm:$0xff]  ;;  %v404_v29 = vld [vmem:[%s1626_s1 + $0x88] sm:$0xff] }
  0x1e   : > { %913 = vmatpush3.msra.mxu0 %v398_v9  ;;  %v388_v30 = vld [vmem:[%s1626_s1 + $0x8] sm:$0xff]  ;;  %v403_v31 = vld [vmem:[%s1626_s1 + $0x80] sm:$0xff]  ;;  %v535_v46 = vld [vmem:[%s1630_s5 + $0x38] sm:$0xff]  ;;  %p1122_p12 = pnand %p1121_p11, %p1283_p5  ;;  %p1129_p2 = por %p1128_p1, %p1127_p0 }
  0x1f   : > { %914 = vmatprep.subr.mxu0 %v413_v10  ;;  %v387_v32 = vld [vmem:[%s1626_s1] sm:$0xff]  ;;  %983 = vmatpush3.msra.mxu1 %v535_v46  ;;  %v534_v47 = vld [vmem:[%s1630_s5 + $0x30] sm:$0xff]  ;;  %v533_v48 = vld [vmem:[%s1630_s5 + $0x28] sm:$0xff] }
  0x20   : > { %915 = vmatpush3.msra.mxu0 %v397_v11  ;;  %v385_v33 = vld [vmem:[%s1328_s13] sm:$0xff]  ;;  %984 = vmatprep.subr.mxu1 %v1182_v45  ;;  %v531_v50 = vld [vmem:[%s1630_s5 + $0x18] sm:$0xff]  ;;  %v530_v51 = vld [vmem:[%s1630_s5 + $0x10] sm:$0xff]  ;;  %p1123_p13 = pneg %p1122_p12 }
  0x21   : > { %916 = vmatprep.subr.mxu0 %v412_v12  ;;  %v892_v36 = vld [vmem:[%s1627_s2] ss:$0 sm:$0xff]  ;;  %985 = vmatpush3.msra.mxu1 %v534_v47  ;;  %v529_v52 = vld [vmem:[%s1630_s5 + $0x8] sm:$0xff]  ;;  %v632_v63 = vld [vmem:[%s1632_s7 + $0x78] sm:$0xff]  ;;  %v804_v47 = vlaneseq }
  0x22   : > { %917 = vmatpush3.msra.mxu0 %v396_v14  ;;  %986 = vmatprep.subr.mxu1 %v1182_v45  ;;  %v532_v49 = vld [vmem:[%s1630_s5 + $0x20] sm:$0xff]  ;;  %v631_v1 = vld [vmem:[%s1632_s7 + $0x70] sm:$0xff]  ;;  %v630_v2 = vld [vmem:[%s1632_s7 + $0x68] sm:$0xff]  ;;  %p1130_p3 = pnand %p1129_p2, %p1123_p13 }
  0x23   : > { %918 = vmatprep.subr.mxu0 %v411_v15  ;;  %987 = vmatpush3.msra.mxu1 %v533_v48  ;;  %v528_v53 = vld [vmem:[%s1630_s5] sm:$0xff]  ;;  %v628_v4 = vld [vmem:[%s1632_s7 + $0x58] sm:$0xff]  ;;  %v627_v5 = vld [vmem:[%s1632_s7 + $0x50] sm:$0xff]  ;;  %v805_v48 = vand.u32 127, %v804_v47 }
  0x24   : > { %919 = vmatpush3.msra.mxu0 %v395_v16  ;;  %988 = vmatprep.subr.mxu1 %v1182_v45  ;;  %v893_v58 = vld [vmem:[%s1628_s3] ss:$0 sm:$0xff]  ;;  %v626_v6 = vld [vmem:[%s1632_s7 + $0x48] sm:$0xff]  ;;  %v624_v8 = vld [vmem:[%s1632_s7 + $0x38] sm:$0xff] }
  0x25   : > { %920 = vmatprep.subr.mxu0 %v410_v17  ;;  %989 = vmatpush3.msra.mxu1 %v532_v49  ;;  %v894_v60 = vld [vmem:[%s1629_s4] ss:$0 sm:$0xff]  ;;  %v623_v9 = vld [vmem:[%s1632_s7 + $0x30] sm:$0xff]  ;;  %v622_v10 = vld [vmem:[%s1632_s7 + $0x28] sm:$0xff]  ;;  %vm806_vm2 = vcmp.lt.s32.totalorder %v805_v48, 8 }
  0x26   : > { %921 = vmatpush3.msra.mxu0 %v394_v18  ;;  %990 = vmatprep.subr.mxu1 %v1182_v45  ;;  %v629_v3 = vld [vmem:[%s1632_s7 + $0x60] sm:$0xff]  ;;  %v620_v12 = vld [vmem:[%s1632_s7 + $0x18] sm:$0xff]  ;;  %v619_v13 = vld [vmem:[%s1632_s7 + $0x10] sm:$0xff] }
  0x27   : > { %922 = vmatprep.subr.mxu0 %v409_v19  ;;  %991 = vmatpush3.msra.mxu1 %v531_v50  ;;  %v625_v7 = vld [vmem:[%s1632_s7 + $0x40] sm:$0xff]  ;;  %v618_v14 = vld [vmem:[%s1632_s7 + $0x8] sm:$0xff]  ;;  %v726_v16 = vld [vmem:[%s1634_s9 + $0x78] sm:$0xff] }
  0x28   : > { %923 = vmatpush3.msra.mxu0 %v393_v20  ;;  %992 = vmatprep.subr.mxu1 %v1182_v45  ;;  %v621_v11 = vld [vmem:[%s1632_s7 + $0x20] sm:$0xff]  ;;  %v725_v17 = vld [vmem:[%s1634_s9 + $0x70] sm:$0xff]  ;;  %v724_v18 = vld [vmem:[%s1634_s9 + $0x68] sm:$0xff] }
  0x29   : > { %924 = vmatprep.subr.mxu0 %v408_v21  ;;  %993 = vmatpush3.msra.mxu1 %v530_v51  ;;  %v617_v15 = vld [vmem:[%s1632_s7] sm:$0xff]  ;;  %v722_v20 = vld [vmem:[%s1634_s9 + $0x58] sm:$0xff]  ;;  %v721_v21 = vld [vmem:[%s1634_s9 + $0x50] sm:$0xff] }
  0x2a   : > { %925 = vmatpush3.msra.mxu0 %v392_v22  ;;  %994 = vmatprep.subr.mxu1 %v1182_v45  ;;  %v723_v19 = vld [vmem:[%s1634_s9 + $0x60] sm:$0xff]  ;;  %v720_v22 = vld [vmem:[%s1634_s9 + $0x48] sm:$0xff] }
  0x2b   : > { %926 = vmatprep.subr.mxu0 %v407_v23  ;;  %995 = vmatpush3.msra.mxu1 %v529_v52  ;;  %v719_v23 = vld [vmem:[%s1634_s9 + $0x40] sm:$0xff] }
  0x2c   : > { %927 = vmatpush3.msra.mxu0 %v391_v24  ;;  %996 = vmatprep.subr.mxu1 %v1182_v45  ;;  %v718_v24 = vld [vmem:[%s1634_s9 + $0x38] sm:$0xff] }
  0x2d   : > { %928 = vmatprep.subr.mxu0 %v406_v25  ;;  %997 = vmatpush3.msra.mxu1 %v528_v53  ;;  %v717_v25 = vld [vmem:[%s1634_s9 + $0x30] sm:$0xff] }
  0x2e   : > { %929 = vmatpush3.msra.mxu0 %v390_v26  ;;  %1001 = vmatprep.subr.mxu1 %v1182_v45  ;;  %v716_v26 = vld [vmem:[%s1634_s9 + $0x28] sm:$0xff] }
  0x2f   : > { %930 = vmatprep.subr.mxu0 %v405_v27  ;;  %v715_v27 = vld [vmem:[%s1634_s9 + $0x20] sm:$0xff] }
  0x30   : > { %931 = vmatpush3.msra.mxu0 %v389_v28  ;;  %v714_v28 = vld [vmem:[%s1634_s9 + $0x18] sm:$0xff] }
  0x31   : > { %932 = vmatprep.subr.mxu0 %v404_v29  ;;  %v895_v29 = vld [vmem:[%s1631_s6] ss:$0 sm:$0xff] }
  0x32   : > { %933 = vmatpush3.msra.mxu0 %v388_v30 }
  0x33   : > { %934 = vmatprep.subr.mxu0 %v403_v31 }
  0x34   : > { %935 = vmatpush3.msra.mxu0 %v387_v32 }
  0x35   : > { %491 = vmatmul.mubr.f32.vlgmr.msra.gmra.mxu0 %v385_v33  ;;  %1036 = vmatprep.subr.mxu0 %v1182_v45 }
  0x36   : > { %1068 = vmatprep.mubr.msk.f32.mxu0 %vm1183_vm1, %v1182_v45  ;;  %1037 = vmatpush3.msra.mxu0 %v726_v16 }
  0x37   : > { %1038 = vmatprep.subr.mxu0 %v1182_v45 }
  0x38   : > { %1039 = vmatpush3.msra.mxu0 %v725_v17 }
  0x39   : > { %1040 = vmatprep.subr.mxu0 %v1182_v45 }
  0x3a   : > { %1041 = vmatpush3.msra.mxu0 %v724_v18 }
  0x3b   : > { %1042 = vmatprep.subr.mxu0 %v1182_v45 }
  0x3c   : > { %1043 = vmatpush3.msra.mxu0 %v723_v19 }
  0x3d   : > { %1044 = vmatprep.subr.mxu0 %v1182_v45 }
  0x3e   : > { %1045 = vmatpush3.msra.mxu0 %v722_v20 }
  0x3f   : > { %1046 = vmatprep.subr.mxu0 %v1182_v45 }
  0x40   : > { %1047 = vmatpush3.msra.mxu0 %v721_v21 }
  0x41   : > { %1048 = vmatprep.subr.mxu0 %v1182_v45 }
  0x42   : > { %1049 = vmatpush3.msra.mxu0 %v720_v22 }
  0x43   : > { %1050 = vmatprep.subr.mxu0 %v1182_v45 }
  0x44   : > { %1051 = vmatpush3.msra.mxu0 %v719_v23 }
  0x45   : > { %1052 = vmatprep.subr.mxu0 %v1182_v45 }
  0x46   : > { %1053 = vmatpush3.msra.mxu0 %v718_v24 }
  0x47   : > { %1054 = vmatprep.subr.mxu0 %v1182_v45 }
  0x48   : > { %1055 = vmatpush3.msra.mxu0 %v717_v25 }
  0x49   : > { %1056 = vmatprep.subr.mxu0 %v1182_v45 }
  0x4a   : > { %1057 = vmatpush3.msra.mxu0 %v716_v26 }
  0x4b   : > { %1058 = vmatprep.subr.mxu0 %v1182_v45 }
  0x4c   : > { %1059 = vmatpush3.msra.mxu0 %v715_v27 }
  0x4d   : > { %1060 = vmatprep.subr.mxu0 %v1182_v45 }
  0x4e   : > { %1061 = vmatpush3.msra.mxu0 %v714_v28 }
  0x4f   : > { %1062 = vmatprep.subr.mxu0 %v1182_v45 }
  0xf5   : > { %v936_v34 = vpop.f32.mrf.mxu0 }
  0xf7   : > { %v937_v35 = vpop.f32.mrf.mxu0 }
  0xf8   : > { %v938_v37 = vadd.f32 %v937_v35, %v936_v34  ;;  %v713_v34 = vld [vmem:[%s1634_s9 + $0x10] sm:$0xff]  ;;  %v712_v35 = vld [vmem:[%s1634_s9 + $0x8] sm:$0xff] }
  0xf9   : > { %1063 = vmatpush3.msra.mxu0 %v713_v34 }
  0xfa   : > { %v493_v38 = vadd.f32 %v938_v37, %v892_v36  ;;  %1064 = vmatprep.subr.mxu0 %v1182_v45  ;;  %v711_v36 = vld [vmem:[%s1634_s9] sm:$0xff] }
  0xfb   : > { %1065 = vmatpush3.msra.mxu0 %v712_v35  ;;  %v897_v37 = vld [vmem:[%s1633_s8] ss:$0 sm:$0xff] }
  0xfc   : > { %v497_v39 = vsel %vm496_vm0, %v493_v38, 0.0  ;;  %1066 = vmatprep.subr.mxu0 %v1182_v45 }
  0xfd   : > { %498 = vadd.xlane.f32.xlu0 %v497_v39  ;;  %1067 = vmatpush3.msra.mxu0 %v711_v36 }
 0x186   : > { %v499_v40 = vpop.xlane.xlu0 %498 }
 0x187   : > { %v501_v41 = vmul.f32 0.015625, %v499_v40 }
 0x189   : > { %v502_v42 = vsub.f32 %v493_v38, %v501_v41 }
 0x18b   : > { %v503_v43 = vmul.f32 %v502_v42, %v502_v42 }
 0x18d   : > { %v504_v44 = vsel %vm496_vm0, %v503_v43, 0.0 }
 0x18e   : > { %505 = vadd.xlane.f32.xlu0 %v504_v44 }
 0x217   : > { %v506_v54 = vpop.xlane.xlu0 %505 }
 0x218   : > { %v507_v55 = vmul.f32 0.015625, %v506_v54 }
 0x21a   : > { %v508_v56 = vadd.f32 1e-05, %v507_v55 }
 0x21c   : > { %1112 = vrsqrt.f32 %v508_v56 }
 0x229   : > { %v1113_v57 = vpop.eup %1112 }
 0x22a   : > { %v510_v59 = vmul.f32 %v1113_v57, %v502_v42  ;;  %v898_v42 = vld [vmem:[%s1635_s10] ss:$0 sm:$0xff] }
 0x22c   : > { %v518_v61 = vmul.f32 %v893_v58, %v510_v59 }
 0x22e   : > { %v526_v62 = vadd.f32 %v894_v60, %v518_v61 }
 0x230   : > { %1114 = vtanh.f32 %v526_v62 }
 0x23d   : > { %v1115_v0 = vpop.eup %1114 }
 0x23e   : > { %999 = vmatmul.mubr.msk.f32.vlgmr.msra.gmra.mxu1 %vm496_vm0, %v1115_v0 }
 0x23f   : > { %1002 = vmatpush3.msra.mxu1 %v632_v63  ;;  %1033 = vmatprep.mubr.msk.f32.mxu1 %vm1183_vm1, %v1182_v45 }
 0x240   : > { %1003 = vmatprep.subr.mxu1 %v1182_v45 }
 0x241   : > { %1004 = vmatpush3.msra.mxu1 %v631_v1 }
 0x242   : > { %1005 = vmatprep.subr.mxu1 %v1182_v45 }
 0x243   : > { %1006 = vmatpush3.msra.mxu1 %v630_v2 }
 0x244   : > { %1007 = vmatprep.subr.mxu1 %v1182_v45 }
 0x245   : > { %1008 = vmatpush3.msra.mxu1 %v629_v3 }
 0x246   : > { %1009 = vmatprep.subr.mxu1 %v1182_v45 }
 0x247   : > { %1010 = vmatpush3.msra.mxu1 %v628_v4 }
 0x248   : > { %1011 = vmatprep.subr.mxu1 %v1182_v45 }
 0x249   : > { %1012 = vmatpush3.msra.mxu1 %v627_v5 }
 0x24a   : > { %1013 = vmatprep.subr.mxu1 %v1182_v45 }
 0x24b   : > { %1014 = vmatpush3.msra.mxu1 %v626_v6 }
 0x24c   : > { %1015 = vmatprep.subr.mxu1 %v1182_v45 }
 0x24d   : > { %1016 = vmatpush3.msra.mxu1 %v625_v7 }
 0x24e   : > { %1017 = vmatprep.subr.mxu1 %v1182_v45 }
 0x24f   : > { %1018 = vmatpush3.msra.mxu1 %v624_v8 }
 0x250   : > { %1019 = vmatprep.subr.mxu1 %v1182_v45 }
 0x251   : > { %1020 = vmatpush3.msra.mxu1 %v623_v9 }
 0x252   : > { %1021 = vmatprep.subr.mxu1 %v1182_v45 }
 0x253   : > { %1022 = vmatpush3.msra.mxu1 %v622_v10 }
 0x254   : > { %1023 = vmatprep.subr.mxu1 %v1182_v45 }
 0x255   : > { %1024 = vmatpush3.msra.mxu1 %v621_v11 }
 0x256   : > { %1025 = vmatprep.subr.mxu1 %v1182_v45 }
 0x257   : > { %1026 = vmatpush3.msra.mxu1 %v620_v12 }
 0x258   : > { %1027 = vmatprep.subr.mxu1 %v1182_v45 }
 0x259   : > { %1028 = vmatpush3.msra.mxu1 %v619_v13 }
 0x25a   : > { %1029 = vmatprep.subr.mxu1 %v1182_v45 }
 0x25b   : > { %1030 = vmatpush3.msra.mxu1 %v618_v14 }
 0x25c   : > { %1031 = vmatprep.subr.mxu1 %v1182_v45 }
 0x25d   : > { %1032 = vmatpush3.msra.mxu1 %v617_v15 }
 0x2fe   : > { %v612_v30 = vpop.f32.mrf.mxu1 }
 0x2ff   : > { %v613_v31 = vadd.f32 %v895_v29, %v612_v30 }
 0x300   : > { %v1000_v32 = vpop.f32.mrf.mxu1 }
 0x301   : > { %v616_v33 = vmax.f32 %v613_v31, 0.0 }
 0x303   : > { %1034 = vmatmul.mubr.f32.vlgmr.msra.gmra.mxu1 %v616_v33 }
 0x3c3   : > { %v706_v38 = vpop.f32.mrf.mxu1 }
 0x3c4   : > { %v707_v39 = vadd.f32 %v897_v37, %v706_v38 }
 0x3c5   : > { %v1035_v40 = vpop.f32.mrf.mxu1 }
 0x3c6   : > { %v710_v41 = vmax.f32 %v707_v39, 0.0 }
 0x3c8   : > { %1069 = vmatmul.mubr.f32.vlgmr.msra.gmra.mxu0 %v710_v41 }
 0x488   : > { %v800_v43 = vpop.f32.mrf.mxu0 }
 0x489   : > { %v801_v44 = vadd.f32 %v898_v42, %v800_v43 }
 0x48a   : > { %v1070_v45 = vpop.f32.mrf.mxu0 }
 0x48b   : > { %v808_v46 = vmul.f32 1.442695, %v801_v44  ;;  %1116 = vtanh.f32 %v801_v44 }
 0x48d   : > { %1118 = vpow2.f32 %v808_v46 }
 0x498   : > { %v1117_v49 = vpop.eup %1116 }
 0x49a   : > { %v1119_v50 = vpop.eup %1118 }
 0x49b   : > { %v810_v51 = vsel %vm806_vm2, %v1117_v49, %v1119_v50 }
 0x49c   : > { %811 = vst [vmem:[%s379_s12] sm:$0xff] %v810_v51 }
 0x49d   : > { %1133 = shalt.err (!%p1130_p3)
}
 0x49e   : > { %s1134_s25 = scalar_lea.hbm %s1590_s16, 128  ;;  %s1138_s12 = scalar_lea.hbm %s1636_s11, 256 }
 0x49f   : > { %p1135_p4 = scmp.ne.s32.totalorder %s1590_s16, %s1134_s25  ;;  %p1139_p9 = scmp.lt.s32.totalorder %s1590_s16, %s1636_s11 }
 0x4a0   : > { %p1140_p10 = scmp.lt.s32.totalorder %s1138_s12, %s1134_s25 }
 0x4a1   : > { %p1136_p7 = pnand %p1135_p4, %p1283_p5 }
 0x4a2   : > { %p1141_p11 = por %p1140_p10, %p1139_p9 }
 0x4a3   : > { %p1137_p8 = pneg %p1136_p7 }
 0x4a5   : > { %p1142_p12 = pnand %p1141_p11, %p1137_p8 }
 0x4a7   : > { %1145 = shalt.err (!%p1142_p12)
}
 0x4a8   : > { %1071 = dma.vmem_to_hbm [thread:$0]  (%p1283_p5), %s827_s29, 128, %s1590_s16, %s813_s22  }
 0x4a9 PF: > { %p1077_p13 = scmp.ge.s32.totalorder %s1180_s20, 2  ;;  %s838_s24 = sand.u32 1, %s1168_s17  }
 0x4aa   : > { %s839_s21 = scalar_lea.sflag [#allocation3], %s838_s24 }
 0x4ab   : > { %p1074_p0 = pnand %p1077_p13, %p1287_p6 }
 0x4ad   : > { %p1075_p1 = pneg %p1074_p0 }
 0x4af   : > { %1163 = dma.done.wait (%p1075_p1), %s839_s21, 128  }
 0x4b0   : > { %1165 = vsyncadd (%p1075_p1), %s839_s21, 4294967168  ;;  %s1642_s26 = sld [smem:[#allocation5_spill]]  ;;  %p21_p2 = scmp.ge.s32.totalorder %s1270_s23, 4  }
 0x4b1   : > { %s1643_s19 = sld [smem:[#allocation6_spill]]  ;;  %s1644_s17 = smov %s1172_s18 }
 0x4b2   : > { %s1646_s20 = smov %s1270_s23  ;;  %23 = sbr.rel (!%p21_p2) target bundleno = 3 (0x3), region = 99 }
 0x4b6   : > { %s1645_s18 = smov %s1642_s26 }
 0x4b7   :  { %844 = vsyncpa [#allocation3], 1 }
 0x4b8   :  { %846 = vsyncpa [#allocation3 + $0x1], 1 }

// kernel: tpu_custom_call.1
= control target key start
LH: loop header
LB: loop body
LE: loop exit
PB: predicated region body
PF: predicated region fallthrough
CT: control target
= control target key end

     0   :  { %16 = vsyncpa [#allocation3], 0  ;;  %s1625_s0 = inlined_call_operand.vmem [shape: f32[16,256], index: 0, kind: input, shape index: {}]   ;;  %s1626_s1 = inlined_call_operand.vmem [shape: f32[256,64], index: 1, kind: input, shape index: {}]   ;;  %s1627_s2 = inlined_call_operand.vmem [shape: f32[1,64], index: 2, kind: input, shape index: {}]   ;;  %s1628_s3 = inlined_call_operand.vmem [shape: f32[1,64], index: 3, kind: input, shape index: {}]   ;;  %s1629_s4 = inlined_call_operand.vmem [shape: f32[1,64], index: 4, kind: input, shape index: {}]   ;;  %s1630_s5 = inlined_call_operand.vmem [shape: f32[64,128], index: 5, kind: input, shape index: {}]   ;;  %s1631_s6 = inlined_call_operand.vmem [shape: f32[1,128], index: 6, kind: input, shape index: {}]   ;;  %s1632_s7 = inlined_call_operand.vmem [shape: f32[128,128], index: 7, kind: input, shape index: {}]   ;;  %s1633_s8 = inlined_call_operand.vmem [shape: f32[1,128], index: 8, kind: input, shape index: {}]   ;;  %s1634_s9 = inlined_call_operand.vmem [shape: f32[128,128], index: 9, kind: input, shape index: {}]   ;;  %s1635_s10 = inlined_call_operand.vmem [shape: f32[1,128], index: 10, kind: input, shape index: {}]   ;;  %s1636_s11 = inlined_call_operand.hbm [shape: f32[16,128], index: 11, kind: output, shape index: {}]  }
   0x1   :  { %18 = vsyncpa [#allocation3 + $0x1], 0  ;;  %s1245_s17 = smov 0   ;;  %s1247_s18 = smov 0  }
   0x2   :  { %s1249_s19 = smov 0   ;;  %s1251_s20 = smov 0  }
   0x3 LB: > { %1638 = sst [smem:[#allocation5_spill]] %s1176_s19  ;;  %s1266_s21 = sadd.s32 4294967295, %s1180_s20   ;;  %s1180_s20 = sphi %s1251_s20, %s1646_s20   ;;  %s1176_s19 = sphi %s1249_s19, %s1643_s19   ;;  %s1172_s18 = sphi %s1247_s18, %s1645_s18   ;;  %s1168_s17 = sphi %s1245_s17, %s1644_s17  }
   0x4   : > { %s885_s22 = sadd.s32 4294967294, %s1180_s20   ;;  %s1270_s23 = sadd.s32 1, %s1180_s20  }
   0x5   : > { %s267_s24 = sadd.s32 1, %s1176_s19  ;;  %s264_s25 = ssub.s32 %s1180_s20, %s1270_s23 }
   0x6   : > { %p277_p0 = scmp.ne.s32.totalorder %s1176_s19, %s1172_s18  ;;  %p265_p1 = scmp.eq.s32.totalorder %s264_s25, 0 }
   0x7   : > { %p278_p2 = scmp.eq.s32.totalorder %s1266_s21, 1  ;;  %p283_p3 = scmp.ne.s32.totalorder %s1172_s18, %s1168_s17 }
   0x8   : > { %p284_p4 = scmp.eq.s32.totalorder %s885_s22, 1  ;;  %p888_p7 = scmp.ge.s32.totalorder %s1180_s20, 1 }
   0x9   : > { %s1281_s26 = scalar_select %p265_p1, %s1176_s19, %s267_s24  }
   0xa   : > { %p1283_p5 = por %p278_p2, %p277_p0  ;;  %p1287_p6 = por %p284_p4, %p283_p3 }
   0xb   : > { %1639 = sst [smem:[#allocation6_spill]] %s1281_s26  ;;  %p340_p8 = scmp.lt.s32.totalorder %s1180_s20, 3 }
   0xd   : > { %p341_p9 = pnand %p888_p7, %p340_p8 }
   0xe   : > { %p380_p10 = scmp.lt.s32.totalorder (!%p341_p9), %s1266_s21, 1  ;;  %s900_s30 = sshll.u32 (!%p341_p9), %s1266_s21, 7 }
   0xf   : > { %344 = sbr.rel (%p341_p9) target bundleno = 1193 (0x4a9), region = 64  ;;  %s1590_s16 = scalar_lea.hbm (!%p341_p9), %s1636_s11, %s900_s30 }
  0x14   : > { %v418_v0 = vld [vmem:[%s1626_s1 + $0xf8] sm:$0xff]  ;;  %v417_v2 = vld [vmem:[%s1626_s1 + $0xf0] sm:$0xff]  ;;  %v416_v4 = vld [vmem:[%s1626_s1 + $0xe8] sm:$0xff]  ;;  %s381_s29 = scalar_select %p380_p10, %s1266_s21, 1  ;;  %vm496_vm0 = vcmask 523264   ;;  %v1182_v45 = vmov 0.0  }
  0x15   : > { %v402_v1 = vld [vmem:[%s1626_s1 + $0x78] sm:$0xff]  ;;  %904 = vmatprep.subr.mxu0 %v418_v0  ;;  %v401_v3 = vld [vmem:[%s1626_s1 + $0x70] sm:$0xff]  ;;  %v400_v5 = vld [vmem:[%s1626_s1 + $0x68] sm:$0xff]  ;;  %982 = vmatprep.subr.mxu1 %v1182_v45  ;;  %vm1183_vm1 = vmmov 0   ;;  %s1184_s21 = smov [#allocation2]  }
  0x16   : > { %905 = vmatpush3.msra.mxu0 %v402_v1  ;;  %v415_v6 = vld [vmem:[%s1626_s1 + $0xe0] sm:$0xff]  ;;  %s903_s15 = sshll.u32 %s381_s29, 4  ;;  %v414_v8 = vld [vmem:[%s1626_s1 + $0xd8] sm:$0xff]  ;;  %v413_v10 = vld [vmem:[%s1626_s1 + $0xd0] sm:$0xff]  ;;  %998 = vmatprep.mubr.msk.f32.mxu1 %vm1183_vm1, %v1182_v45  ;;  %s1124_s26 = sshll.u32 %s1184_s21, 4  ;;  %s1125_s26 = int_to_ptr.vmem [resolvable:$false] %s1124_s26 }
  0x17   : > { %906 = vmatprep.subr.mxu0 %v417_v2  ;;  %v399_v7 = vld [vmem:[%s1626_s1 + $0x60] sm:$0xff]  ;;  %v398_v9 = vld [vmem:[%s1626_s1 + $0x58] sm:$0xff]  ;;  %s1328_s13 = scalar_lea.vmem %s1625_s0, %s903_s15  ;;  %v397_v11 = vld [vmem:[%s1626_s1 + $0x50] sm:$0xff]  ;;  %s377_s15 = sand.u32 1, %s1172_s18  }
  0x18   : > { %907 = vmatpush3.msra.mxu0 %v401_v3  ;;  %v412_v12 = vld [vmem:[%s1626_s1 + $0xc8] sm:$0xff]  ;;  %v411_v15 = vld [vmem:[%s1626_s1 + $0xc0] sm:$0xff]  ;;  %v410_v17 = vld [vmem:[%s1626_s1 + $0xb8] sm:$0xff]  ;;  %s889_s25 = sshll.u32 %s377_s15, 3  ;;  %s813_s22 = scalar_lea.sflag [#allocation3], %s377_s15 }
  0x19   : > { %908 = vmatprep.subr.mxu0 %v416_v4  ;;  %v386_v13 = vld [vmem:[%s1328_s13 + $0x8] sm:$0xff]  ;;  %v395_v16 = vld [vmem:[%s1626_s1 + $0x40] sm:$0xff]  ;;  %v394_v18 = vld [vmem:[%s1626_s1 + $0x38] sm:$0xff]  ;;  %s379_s12 = scalar_lea.vmem [#allocation2], %s889_s25  ;;  %s1126_s19 = scalar_lea.vmem %s1125_s26, 256 }
  0x1a   : > { %909 = vmatpush3.msra.mxu0 %v400_v5  ;;  %v396_v14 = vld [vmem:[%s1626_s1 + $0x48] sm:$0xff]  ;;  %490 = vmatprep.mubr.f32.mxu0 %v386_v13  ;;  %v409_v19 = vld [vmem:[%s1626_s1 + $0xb0] sm:$0xff]  ;;  %v407_v23 = vld [vmem:[%s1626_s1 + $0xa0] sm:$0xff]  ;;  %s826_s29 = sshll.u32 %s379_s12, 4  ;;  %s827_s29 = int_to_ptr.vmem [resolvable:$true] %s826_s29 }
  0x1b   : > { %910 = vmatprep.subr.mxu0 %v415_v6  ;;  %v393_v20 = vld [vmem:[%s1626_s1 + $0x30] sm:$0xff]  ;;  %v408_v21 = vld [vmem:[%s1626_s1 + $0xa8] sm:$0xff]  ;;  %v391_v24 = vld [vmem:[%s1626_s1 + $0x20] sm:$0xff]  ;;  %s1120_s24 = scalar_lea.vmem %s827_s29, 128  ;;  %p1127_p0 = scmp.lt.s32.totalorder %s827_s29, %s1125_s26 }
  0x1c   : > { %911 = vmatpush3.msra.mxu0 %v399_v7  ;;  %v392_v22 = vld [vmem:[%s1626_s1 + $0x28] sm:$0xff]  ;;  %v406_v25 = vld [vmem:[%s1626_s1 + $0x98] sm:$0xff]  ;;  %v405_v27 = vld [vmem:[%s1626_s1 + $0x90] sm:$0xff]  ;;  %p1121_p11 = scmp.ne.s32.totalorder %s827_s29, %s1120_s24  ;;  %p1128_p1 = scmp.lt.s32.totalorder %s1126_s19, %s1120_s24 }
  0x1d   : > { %912 = vmatprep.subr.mxu0 %v414_v8  ;;  %v390_v26 = vld [vmem:[%s1626_s1 + $0x18] sm:$0xff]  ;;  %v389_v28 = vld [vmem:[%s1626_s1 + $0x10] sm:$0xff]  ;;  %v404_v29 = vld [vmem:[%s1626_s1 + $0x88] sm:$0xff] }
  0x1e   : > { %913 = vmatpush3.msra.mxu0 %v398_v9  ;;  %v388_v30 = vld [vmem:[%s1626_s1 + $0x8] sm:$0xff]  ;;  %v403_v31 = vld [vmem:[%s1626_s1 + $0x80] sm:$0xff]  ;;  %v535_v46 = vld [vmem:[%s1630_s5 + $0x38] sm:$0xff]  ;;  %p1122_p12 = pnand %p1121_p11, %p1283_p5  ;;  %p1129_p2 = por %p1128_p1, %p1127_p0 }
  0x1f   : > { %914 = vmatprep.subr.mxu0 %v413_v10  ;;  %v387_v32 = vld [vmem:[%s1626_s1] sm:$0xff]  ;;  %983 = vmatpush3.msra.mxu1 %v535_v46  ;;  %v534_v47 = vld [vmem:[%s1630_s5 + $0x30] sm:$0xff]  ;;  %v533_v48 = vld [vmem:[%s1630_s5 + $0x28] sm:$0xff] }
  0x20   : > { %915 = vmatpush3.msra.mxu0 %v397_v11  ;;  %v385_v33 = vld [vmem:[%s1328_s13] sm:$0xff]  ;;  %984 = vmatprep.subr.mxu1 %v1182_v45  ;;  %v531_v50 = vld [vmem:[%s1630_s5 + $0x18] sm:$0xff]  ;;  %v530_v51 = vld [vmem:[%s1630_s5 + $0x10] sm:$0xff]  ;;  %p1123_p13 = pneg %p1122_p12 }
  0x21   : > { %916 = vmatprep.subr.mxu0 %v412_v12  ;;  %v892_v36 = vld [vmem:[%s1627_s2] ss:$0 sm:$0xff]  ;;  %985 = vmatpush3.msra.mxu1 %v534_v47  ;;  %v529_v52 = vld [vmem:[%s1630_s5 + $0x8] sm:$0xff]  ;;  %v632_v63 = vld [vmem:[%s1632_s7 + $0x78] sm:$0xff]  ;;  %v804_v47 = vlaneseq }
  0x22   : > { %917 = vmatpush3.msra.mxu0 %v396_v14  ;;  %986 = vmatprep.subr.mxu1 %v1182_v45  ;;  %v532_v49 = vld [vmem:[%s1630_s5 + $0x20] sm:$0xff]  ;;  %v631_v1 = vld [vmem:[%s1632_s7 + $0x70] sm:$0xff]  ;;  %v630_v2 = vld [vmem:[%s1632_s7 + $0x68] sm:$0xff]  ;;  %p1130_p3 = pnand %p1129_p2, %p1123_p13 }
  0x23   : > { %918 = vmatprep.subr.mxu0 %v411_v15  ;;  %987 = vmatpush3.msra.mxu1 %v533_v48  ;;  %v528_v53 = vld [vmem:[%s1630_s5] sm:$0xff]  ;;  %v628_v4 = vld [vmem:[%s1632_s7 + $0x58] sm:$0xff]  ;;  %v627_v5 = vld [vmem:[%s1632_s7 + $0x50] sm:$0xff]  ;;  %v805_v48 = vand.u32 127, %v804_v47 }
  0x24   : > { %919 = vmatpush3.msra.mxu0 %v395_v16  ;;  %988 = vmatprep.subr.mxu1 %v1182_v45  ;;  %v893_v58 = vld [vmem:[%s1628_s3] ss:$0 sm:$0xff]  ;;  %v626_v6 = vld [vmem:[%s1632_s7 + $0x48] sm:$0xff]  ;;  %v624_v8 = vld [vmem:[%s1632_s7 + $0x38] sm:$0xff] }
  0x25   : > { %920 = vmatprep.subr.mxu0 %v410_v17  ;;  %989 = vmatpush3.msra.mxu1 %v532_v49  ;;  %v894_v60 = vld [vmem:[%s1629_s4] ss:$0 sm:$0xff]  ;;  %v623_v9 = vld [vmem:[%s1632_s7 + $0x30] sm:$0xff]  ;;  %v622_v10 = vld [vmem:[%s1632_s7 + $0x28] sm:$0xff]  ;;  %vm806_vm2 = vcmp.lt.s32.totalorder %v805_v48, 8 }
  0x26   : > { %921 = vmatpush3.msra.mxu0 %v394_v18  ;;  %990 = vmatprep.subr.mxu1 %v1182_v45  ;;  %v629_v3 = vld [vmem:[%s1632_s7 + $0x60] sm:$0xff]  ;;  %v620_v12 = vld [vmem:[%s1632_s7 + $0x18] sm:$0xff]  ;;  %v619_v13 = vld [vmem:[%s1632_s7 + $0x10] sm:$0xff] }
  0x27   : > { %922 = vmatprep.subr.mxu0 %v409_v19  ;;  %991 = vmatpush3.msra.mxu1 %v531_v50  ;;  %v625_v7 = vld [vmem:[%s1632_s7 + $0x40] sm:$0xff]  ;;  %v618_v14 = vld [vmem:[%s1632_s7 + $0x8] sm:$0xff]  ;;  %v726_v16 = vld [vmem:[%s1634_s9 + $0x78] sm:$0xff] }
  0x28   : > { %923 = vmatpush3.msra.mxu0 %v393_v20  ;;  %992 = vmatprep.subr.mxu1 %v1182_v45  ;;  %v621_v11 = vld [vmem:[%s1632_s7 + $0x20] sm:$0xff]  ;;  %v725_v17 = vld [vmem:[%s1634_s9 + $0x70] sm:$0xff]  ;;  %v724_v18 = vld [vmem:[%s1634_s9 + $0x68] sm:$0xff] }
  0x29   : > { %924 = vmatprep.subr.mxu0 %v408_v21  ;;  %993 = vmatpush3.msra.mxu1 %v530_v51  ;;  %v617_v15 = vld [vmem:[%s1632_s7] sm:$0xff]  ;;  %v722_v20 = vld [vmem:[%s1634_s9 + $0x58] sm:$0xff]  ;;  %v721_v21 = vld [vmem:[%s1634_s9 + $0x50] sm:$0xff] }
  0x2a   : > { %925 = vmatpush3.msra.mxu0 %v392_v22  ;;  %994 = vmatprep.subr.mxu1 %v1182_v45  ;;  %v723_v19 = vld [vmem:[%s1634_s9 + $0x60] sm:$0xff]  ;;  %v720_v22 = vld [vmem:[%s1634_s9 + $0x48] sm:$0xff] }
  0x2b   : > { %926 = vmatprep.subr.mxu0 %v407_v23  ;;  %995 = vmatpush3.msra.mxu1 %v529_v52  ;;  %v719_v23 = vld [vmem:[%s1634_s9 + $0x40] sm:$0xff] }
  0x2c   : > { %927 = vmatpush3.msra.mxu0 %v391_v24  ;;  %996 = vmatprep.subr.mxu1 %v1182_v45  ;;  %v718_v24 = vld [vmem:[%s1634_s9 + $0x38] sm:$0xff] }
  0x2d   : > { %928 = vmatprep.subr.mxu0 %v406_v25  ;;  %997 = vmatpush3.msra.mxu1 %v528_v53  ;;  %v717_v25 = vld [vmem:[%s1634_s9 + $0x30] sm:$0xff] }
  0x2e   : > { %929 = vmatpush3.msra.mxu0 %v390_v26  ;;  %1001 = vmatprep.subr.mxu1 %v1182_v45  ;;  %v716_v26 = vld [vmem:[%s1634_s9 + $0x28] sm:$0xff] }
  0x2f   : > { %930 = vmatprep.subr.mxu0 %v405_v27  ;;  %v715_v27 = vld [vmem:[%s1634_s9 + $0x20] sm:$0xff] }
  0x30   : > { %931 = vmatpush3.msra.mxu0 %v389_v28  ;;  %v714_v28 = vld [vmem:[%s1634_s9 + $0x18] sm:$0xff] }
  0x31   : > { %932 = vmatprep.subr.mxu0 %v404_v29  ;;  %v895_v29 = vld [vmem:[%s1631_s6] ss:$0 sm:$0xff] }
  0x32   : > { %933 = vmatpush3.msra.mxu0 %v388_v30 }
  0x33   : > { %934 = vmatprep.subr.mxu0 %v403_v31 }
  0x34   : > { %935 = vmatpush3.msra.mxu0 %v387_v32 }
  0x35   : > { %491 = vmatmul.mubr.f32.vlgmr.msra.gmra.mxu0 %v385_v33  ;;  %1036 = vmatprep.subr.mxu0 %v1182_v45 }
  0x36   : > { %1068 = vmatprep.mubr.msk.f32.mxu0 %vm1183_vm1, %v1182_v45  ;;  %1037 = vmatpush3.msra.mxu0 %v726_v16 }
  0x37   : > { %1038 = vmatprep.subr.mxu0 %v1182_v45 }
  0x38   : > { %1039 = vmatpush3.msra.mxu0 %v725_v17 }
  0x39   : > { %1040 = vmatprep.subr.mxu0 %v1182_v45 }
  0x3a   : > { %1041 = vmatpush3.msra.mxu0 %v724_v18 }
  0x3b   : > { %1042 = vmatprep.subr.mxu0 %v1182_v45 }
  0x3c   : > { %1043 = vmatpush3.msra.mxu0 %v723_v19 }
  0x3d   : > { %1044 = vmatprep.subr.mxu0 %v1182_v45 }
  0x3e   : > { %1045 = vmatpush3.msra.mxu0 %v722_v20 }
  0x3f   : > { %1046 = vmatprep.subr.mxu0 %v1182_v45 }
  0x40   : > { %1047 = vmatpush3.msra.mxu0 %v721_v21 }
  0x41   : > { %1048 = vmatprep.subr.mxu0 %v1182_v45 }
  0x42   : > { %1049 = vmatpush3.msra.mxu0 %v720_v22 }
  0x43   : > { %1050 = vmatprep.subr.mxu0 %v1182_v45 }
  0x44   : > { %1051 = vmatpush3.msra.mxu0 %v719_v23 }
  0x45   : > { %1052 = vmatprep.subr.mxu0 %v1182_v45 }
  0x46   : > { %1053 = vmatpush3.msra.mxu0 %v718_v24 }
  0x47   : > { %1054 = vmatprep.subr.mxu0 %v1182_v45 }
  0x48   : > { %1055 = vmatpush3.msra.mxu0 %v717_v25 }
  0x49   : > { %1056 = vmatprep.subr.mxu0 %v1182_v45 }
  0x4a   : > { %1057 = vmatpush3.msra.mxu0 %v716_v26 }
  0x4b   : > { %1058 = vmatprep.subr.mxu0 %v1182_v45 }
  0x4c   : > { %1059 = vmatpush3.msra.mxu0 %v715_v27 }
  0x4d   : > { %1060 = vmatprep.subr.mxu0 %v1182_v45 }
  0x4e   : > { %1061 = vmatpush3.msra.mxu0 %v714_v28 }
  0x4f   : > { %1062 = vmatprep.subr.mxu0 %v1182_v45 }
  0xf5   : > { %v936_v34 = vpop.f32.mrf.mxu0 }
  0xf7   : > { %v937_v35 = vpop.f32.mrf.mxu0 }
  0xf8   : > { %v938_v37 = vadd.f32 %v937_v35, %v936_v34  ;;  %v713_v34 = vld [vmem:[%s1634_s9 + $0x10] sm:$0xff]  ;;  %v712_v35 = vld [vmem:[%s1634_s9 + $0x8] sm:$0xff] }
  0xf9   : > { %1063 = vmatpush3.msra.mxu0 %v713_v34 }
  0xfa   : > { %v493_v38 = vadd.f32 %v938_v37, %v892_v36  ;;  %1064 = vmatprep.subr.mxu0 %v1182_v45  ;;  %v711_v36 = vld [vmem:[%s1634_s9] sm:$0xff] }
  0xfb   : > { %1065 = vmatpush3.msra.mxu0 %v712_v35  ;;  %v897_v37 = vld [vmem:[%s1633_s8] ss:$0 sm:$0xff] }
  0xfc   : > { %v497_v39 = vsel %vm496_vm0, %v493_v38, 0.0  ;;  %1066 = vmatprep.subr.mxu0 %v1182_v45 }
  0xfd   : > { %498 = vadd.xlane.f32.xlu0 %v497_v39  ;;  %1067 = vmatpush3.msra.mxu0 %v711_v36 }
 0x186   : > { %v499_v40 = vpop.xlane.xlu0 %498 }
 0x187   : > { %v501_v41 = vmul.f32 0.015625, %v499_v40 }
 0x189   : > { %v502_v42 = vsub.f32 %v493_v38, %v501_v41 }
 0x18b   : > { %v503_v43 = vmul.f32 %v502_v42, %v502_v42 }
 0x18d   : > { %v504_v44 = vsel %vm496_vm0, %v503_v43, 0.0 }
 0x18e   : > { %505 = vadd.xlane.f32.xlu0 %v504_v44 }
 0x217   : > { %v506_v54 = vpop.xlane.xlu0 %505 }
 0x218   : > { %v507_v55 = vmul.f32 0.015625, %v506_v54 }
 0x21a   : > { %v508_v56 = vadd.f32 1e-05, %v507_v55 }
 0x21c   : > { %1112 = vrsqrt.f32 %v508_v56 }
 0x229   : > { %v1113_v57 = vpop.eup %1112 }
 0x22a   : > { %v510_v59 = vmul.f32 %v1113_v57, %v502_v42  ;;  %v898_v42 = vld [vmem:[%s1635_s10] ss:$0 sm:$0xff] }
 0x22c   : > { %v518_v61 = vmul.f32 %v893_v58, %v510_v59 }
 0x22e   : > { %v526_v62 = vadd.f32 %v894_v60, %v518_v61 }
 0x230   : > { %1114 = vtanh.f32 %v526_v62 }
 0x23d   : > { %v1115_v0 = vpop.eup %1114 }
 0x23e   : > { %999 = vmatmul.mubr.msk.f32.vlgmr.msra.gmra.mxu1 %vm496_vm0, %v1115_v0 }
 0x23f   : > { %1002 = vmatpush3.msra.mxu1 %v632_v63  ;;  %1033 = vmatprep.mubr.msk.f32.mxu1 %vm1183_vm1, %v1182_v45 }
 0x240   : > { %1003 = vmatprep.subr.mxu1 %v1182_v45 }
 0x241   : > { %1004 = vmatpush3.msra.mxu1 %v631_v1 }
 0x242   : > { %1005 = vmatprep.subr.mxu1 %v1182_v45 }
 0x243   : > { %1006 = vmatpush3.msra.mxu1 %v630_v2 }
 0x244   : > { %1007 = vmatprep.subr.mxu1 %v1182_v45 }
 0x245   : > { %1008 = vmatpush3.msra.mxu1 %v629_v3 }
 0x246   : > { %1009 = vmatprep.subr.mxu1 %v1182_v45 }
 0x247   : > { %1010 = vmatpush3.msra.mxu1 %v628_v4 }
 0x248   : > { %1011 = vmatprep.subr.mxu1 %v1182_v45 }
 0x249   : > { %1012 = vmatpush3.msra.mxu1 %v627_v5 }
 0x24a   : > { %1013 = vmatprep.subr.mxu1 %v1182_v45 }
 0x24b   : > { %1014 = vmatpush3.msra.mxu1 %v626_v6 }
 0x24c   : > { %1015 = vmatprep.subr.mxu1 %v1182_v45 }
 0x24d   : > { %1016 = vmatpush3.msra.mxu1 %v625_v7 }
 0x24e   : > { %1017 = vmatprep.subr.mxu1 %v1182_v45 }
 0x24f   : > { %1018 = vmatpush3.msra.mxu1 %v624_v8 }
 0x250   : > { %1019 = vmatprep.subr.mxu1 %v1182_v45 }
 0x251   : > { %1020 = vmatpush3.msra.mxu1 %v623_v9 }
 0x252   : > { %1021 = vmatprep.subr.mxu1 %v1182_v45 }
 0x253   : > { %1022 = vmatpush3.msra.mxu1 %v622_v10 }
 0x254   : > { %1023 = vmatprep.subr.mxu1 %v1182_v45 }
 0x255   : > { %1024 = vmatpush3.msra.mxu1 %v621_v11 }
 0x256   : > { %1025 = vmatprep.subr.mxu1 %v1182_v45 }
 0x257   : > { %1026 = vmatpush3.msra.mxu1 %v620_v12 }
 0x258   : > { %1027 = vmatprep.subr.mxu1 %v1182_v45 }
 0x259   : > { %1028 = vmatpush3.msra.mxu1 %v619_v13 }
 0x25a   : > { %1029 = vmatprep.subr.mxu1 %v1182_v45 }
 0x25b   : > { %1030 = vmatpush3.msra.mxu1 %v618_v14 }
 0x25c   : > { %1031 = vmatprep.subr.mxu1 %v1182_v45 }
 0x25d   : > { %1032 = vmatpush3.msra.mxu1 %v617_v15 }
 0x2fe   : > { %v612_v30 = vpop.f32.mrf.mxu1 }
 0x2ff   : > { %v613_v31 = vadd.f32 %v895_v29, %v612_v30 }
 0x300   : > { %v1000_v32 = vpop.f32.mrf.mxu1 }
 0x301   : > { %v616_v33 = vmax.f32 %v613_v31, 0.0 }
 0x303   : > { %1034 = vmatmul.mubr.f32.vlgmr.msra.gmra.mxu1 %v616_v33 }
 0x3c3   : > { %v706_v38 = vpop.f32.mrf.mxu1 }
 0x3c4   : > { %v707_v39 = vadd.f32 %v897_v37, %v706_v38 }
 0x3c5   : > { %v1035_v40 = vpop.f32.mrf.mxu1 }
 0x3c6   : > { %v710_v41 = vmax.f32 %v707_v39, 0.0 }
 0x3c8   : > { %1069 = vmatmul.mubr.f32.vlgmr.msra.gmra.mxu0 %v710_v41 }
 0x488   : > { %v800_v43 = vpop.f32.mrf.mxu0 }
 0x489   : > { %v801_v44 = vadd.f32 %v898_v42, %v800_v43 }
 0x48a   : > { %v1070_v45 = vpop.f32.mrf.mxu0 }
 0x48b   : > { %v808_v46 = vmul.f32 1.442695, %v801_v44  ;;  %1116 = vtanh.f32 %v801_v44 }
 0x48d   : > { %1118 = vpow2.f32 %v808_v46 }
 0x498   : > { %v1117_v49 = vpop.eup %1116 }
 0x49a   : > { %v1119_v50 = vpop.eup %1118 }
 0x49b   : > { %v810_v51 = vsel %vm806_vm2, %v1117_v49, %v1119_v50 }
 0x49c   : > { %811 = vst [vmem:[%s379_s12] sm:$0xff] %v810_v51 }
 0x49d   : > { %1133 = shalt.err (!%p1130_p3)
}
 0x49e   : > { %s1134_s25 = scalar_lea.hbm %s1590_s16, 128  ;;  %s1138_s12 = scalar_lea.hbm %s1636_s11, 256 }
 0x49f   : > { %p1135_p4 = scmp.ne.s32.totalorder %s1590_s16, %s1134_s25  ;;  %p1139_p9 = scmp.lt.s32.totalorder %s1590_s16, %s1636_s11 }
 0x4a0   : > { %p1140_p10 = scmp.lt.s32.totalorder %s1138_s12, %s1134_s25 }
 0x4a1   : > { %p1136_p7 = pnand %p1135_p4, %p1283_p5 }
 0x4a2   : > { %p1141_p11 = por %p1140_p10, %p1139_p9 }
 0x4a3   : > { %p1137_p8 = pneg %p1136_p7 }
 0x4a5   : > { %p1142_p12 = pnand %p1141_p11, %p1137_p8 }
 0x4a7   : > { %1145 = shalt.err (!%p1142_p12)
}
 0x4a8   : > { %1071 = dma.vmem_to_hbm [thread:$0]  (%p1283_p5), %s827_s29, 128, %s1590_s16, %s813_s22  }
 0x4a9 PF: > { %p1077_p13 = scmp.ge.s32.totalorder %s1180_s20, 2  ;;  %s838_s24 = sand.u32 1, %s1168_s17  }
 0x4aa   : > { %s839_s21 = scalar_lea.sflag [#allocation3], %s838_s24 }
 0x4ab   : > { %p1074_p0 = pnand %p1077_p13, %p1287_p6 }
 0x4ad   : > { %p1075_p1 = pneg %p1074_p0 }
 0x4af   : > { %1163 = dma.done.wait (%p1075_p1), %s839_s21, 128  }
 0x4b0   : > { %1165 = vsyncadd (%p1075_p1), %s839_s21, 4294967168  ;;  %s1642_s26 = sld [smem:[#allocation5_spill]]  ;;  %p21_p2 = scmp.ge.s32.totalorder %s1270_s23, 4  }
 0x4b1   : > { %s1643_s19 = sld [smem:[#allocation6_spill]]  ;;  %s1644_s17 = smov %s1172_s18 }
 0x4b2   : > { %s1646_s20 = smov %s1270_s23  ;;  %23 = sbr.rel (!%p21_p2) target bundleno = 3 (0x3), region = 99 }
 0x4b6   : > { %s1645_s18 = smov %s1642_s26 }
 0x4b7   :  { %844 = vsyncpa [#allocation3], 1 }
 0x4b8   :  { %846 = vsyncpa [#allocation3 + $0x1], 1 }

</bundles_post_ra>
